<compile_context>
chip_gen: v7x
topology: tpu7x:2x2x1
jax: 0.10.0
libtpu: 0.0.40
codegen_flags: <defaults>
</compile_context>

<pallas_src>
import functools

import jax
import jax.numpy as jnp
from jax.experimental import pallas as pl
from jax.experimental.pallas import tpu as pltpu


def _cdiv(a, b):
    return -(-a // b)


def _nn_upsample2x_kernel(x_ref, o_ref, *, seg_w, n_seg):
    # x_ref: (TR, n_seg * seg_w)     -- n_seg original input rows (width seg_w) per kernel row.
    # o_ref: (TR, 4 * n_seg * seg_w) -- per original row: [lane-dup row | lane-dup row].
    t = x_ref[...]
    tr, wg = t.shape
    # Lane (column) duplication: dup[i, 2k+b] = t[i, k].  Element-local, so it is the correct
    # per-segment duplication even when n_seg > 1.
    dup = jnp.broadcast_to(t[:, :, None], (tr, wg, 2)).reshape(tr, 2 * wg)
    if n_seg == 1:
        # Row duplication comes for free in the (R, 4W) output view: store the same
        # lane-duplicated row into both halves.  Two plain stores, no sublane relayout.
        o_ref[:, : 2 * seg_w] = dup
        o_ref[:, 2 * seg_w:] = dup
    else:
        # Small-W path: duplicate each 2*seg_w segment and emit one dense >=128-lane store.
        segs = []
        for s in range(n_seg):
            seg = dup[:, s * 2 * seg_w:(s + 1) * 2 * seg_w]
            segs.append(seg)
            segs.append(seg)
        o_ref[...] = jnp.concatenate(segs, axis=1)


def _pick_row_tile(num_rows, in_row_bytes, itemsize):
    """Rows of the flattened (num_rows, WG) input processed per grid step."""
    pack = max(8, 32 // itemsize)                    # sublane packing granularity for this dtype
    # ~1 MiB of input per step: mem-bound tilings reach ~85% of HBM roofline there, and the
    # pipelined VMEM footprint (double-buffered in/out + intermediates, ~12-14x the input
    # block) stays far below v7x's 64 MiB physical VMEM.
    target_rows = max(pack, (1 << 20) // max(1, in_row_bytes))
    if num_rows < 2 * pack:
        return num_rows                              # too small to split across cores
    # Prefer an even step count (>= 2) so v7x's two TensorCores get balanced shards.
    steps = max(2, _cdiv(num_rows, target_rows))
    if steps % 2:
        steps += 1
    tr = num_rows
    for s in (steps, steps + 2, steps + 4):
        cand = max(pack, _cdiv(_cdiv(num_rows, s), pack) * pack)
        tr = cand
        if _cdiv(num_rows, cand) % 2 == 0:
            break
    return min(tr, num_rows)


def upsample_nearest_2x(x):
    """Exact equivalent of torch.nn.functional.interpolate(x, [2*h, 2*w]) (mode='nearest')."""
    N, C, H, W = x.shape
    R = N * C * H
    itemsize = jnp.dtype(x.dtype).itemsize

    # Lane-density grouping: fold G consecutive input rows per kernel row when the natural
    # 4*W-wide output row would be narrower than one 128-lane vreg (masked-store territory).
    G = 1
    if 4 * W < 128:
        g_min = _cdiv(128, 4 * W)
        for g in range(g_min, min(4 * g_min, R) + 1):
            if R % g == 0:
                G = g
                break

    RG = R // G
    WG = G * W
    xr = x.reshape(RG, WG)                           # metadata-only (row-major preserved)

    TR = _pick_row_tile(RG, WG * itemsize, itemsize)
    grid = (_cdiv(RG, TR),)

    block_in_bytes = TR * WG * itemsize
    block_out_bytes = 4 * block_in_bytes
    # Honest VMEM budget: double-buffered in/out blocks + materialized lane-dup intermediates
    # + slack; clamp to a range that is safe on every generation (<= 48 MiB << v7x's 64 MiB).
    vmem_limit = 2 * (block_in_bytes + block_out_bytes) + 4 * block_in_bytes + (4 << 20)
    vmem_limit = int(min(max(vmem_limit, 32 << 20), 48 << 20))

    kernel = functools.partial(_nn_upsample2x_kernel, seg_w=W, n_seg=G)

    out2d = pl.pallas_call(
        kernel,
        out_shape=jax.ShapeDtypeStruct((RG, 4 * WG), x.dtype),
        grid=grid,
        in_specs=[pl.BlockSpec((TR, WG), lambda i: (i, 0))],
        out_specs=pl.BlockSpec((TR, 4 * WG), lambda i: (i, 0)),
        compiler_params=pltpu.CompilerParams(
            dimension_semantics=("parallel",),
            vmem_limit_bytes=vmem_limit,
        ),
        cost_estimate=pl.CostEstimate(
            flops=0,
            transcendentals=0,
            bytes_accessed=5 * R * W * itemsize,     # read S, write 4S
        ),
    )(xr)

    return out2d.reshape(N, C, 2 * H, 2 * W)         # metadata-only (row-major preserved)


if __name__ == "__main__":
    key = jax.random.PRNGKey(0)

    # Primary test (matches the module's intended use): W=16 -> small-W grouped path (G=2).
    x = jax.random.normal(key, (2, 4, 16, 16), dtype=jnp.float32)
    z = upsample_nearest_2x(x)
    jax.block_until_ready(z)
    ref = jnp.repeat(jnp.repeat(x, 2, axis=2), 2, axis=3)
    assert z.shape == (2, 4, 32, 32)
    assert z.dtype == x.dtype
    assert bool(jnp.array_equal(z, ref))

    # Secondary check: wide-W path (G=1, two-store fast path, multi-step parallel grid).
    x2 = jax.random.normal(jax.random.PRNGKey(1), (1, 2, 8, 64), dtype=jnp.float32)
    z2 = upsample_nearest_2x(x2)
    jax.block_until_ready(z2)
    ref2 = jnp.repeat(jnp.repeat(x2, 2, axis=2), 2, axis=3)
    assert z2.shape == (1, 2, 16, 128)
    assert bool(jnp.array_equal(z2, ref2))

    print("KERNEL_OK")
</pallas_src>

<mosaic_0001>
module attributes {stable_mosaic.version = 11 : i64} {
  func.func @_nn_upsample2x_kernel(%arg0: i32, %arg1: memref<32x32xf32, #tpu.memory_space<vmem>>, %arg2: memref<32x128xf32, #tpu.memory_space<vmem>>) attributes {dimension_semantics = [#tpu.dimension_semantics<parallel>], iteration_bounds = array<i64: 2>, scalar_prefetch = 0 : i64, scratch_operands = 0 : i64, tpu.core_type = #tpu.core_type<tc>, window_params = [{transform_indices = @transform_0, window_bounds = array<i64: 32, 32>}, {transform_indices = @transform_1, window_bounds = array<i64: 32, 128>}]} {
    %c0 = arith.constant 0 : index
    %c0_0 = arith.constant 0 : index
    %0 = vector.load %arg1[%c0, %c0_0] : memref<32x32xf32, #tpu.memory_space<vmem>>, vector<32x32xf32>
    %1 = vector.shape_cast %0 : vector<32x32xf32> to vector<32x32x1xf32>
    %2 = vector.shape_cast %1 : vector<32x32x1xf32> to vector<32x32x1xf32>
    %3 = vector.broadcast %2 : vector<32x32x1xf32> to vector<32x32x2xf32>
    %4 = vector.shape_cast %3 : vector<32x32x2xf32> to vector<32x64xf32>
    %5 = vector.extract_strided_slice %4 {offsets = [0, 0], sizes = [32, 32], strides = [1, 1]} : vector<32x64xf32> to vector<32x32xf32>
    %6 = vector.extract_strided_slice %4 {offsets = [0, 32], sizes = [32, 32], strides = [1, 1]} : vector<32x64xf32> to vector<32x32xf32>
    %7 = tpu.concatenate %5, %5, %6, %6 in 1 : vector<32x32xf32>, vector<32x32xf32>, vector<32x32xf32>, vector<32x32xf32> -> vector<32x128xf32>
    %c0_1 = arith.constant 0 : index
    %c0_2 = arith.constant 0 : index
    %8 = vector.load %arg2[%c0_1, %c0_2] : memref<32x128xf32, #tpu.memory_space<vmem>>, vector<32x128xf32>
    tpu.vector_store %arg2[%c0_1, %c0_2], %7 {strides = array<i32>} : memref<32x128xf32, #tpu.memory_space<vmem>>, vector<32x128xf32>,
    return
  }
  func.func @transform_0(%arg0: i32) -> (i32, i32) {
    %c0_i32 = arith.constant 0 : i32
    %c0_i32_0 = arith.constant 0 : i32
    return %arg0, %c0_i32 : i32, i32
  }
  func.func @transform_1(%arg0: i32) -> (i32, i32) {
    %c0_i32 = arith.constant 0 : i32
    %c0_i32_0 = arith.constant 0 : i32
    return %arg0, %c0_i32 : i32, i32
  }
}

</mosaic_0001>

<bundles_post_ra>
// kernel: tpu_custom_call.1
= control target key start
LH: loop header
LB: loop body
LE: loop exit
PB: predicated region body
PF: predicated region fallthrough
CT: control target
= control target key end

     0   :  { %6 = vsyncpa [#allocation3], 0  ;;  %s5697_s0 = inlined_call_operand.vmem [shape: f32[64,32], index: 0, kind: input, shape index: {}]   ;;  %s5698_s1 = inlined_call_operand.hbm [shape: f32[64,128], index: 1, kind: output, shape index: {}]  }
   0x1   :  { %8 = vsyncpa [#allocation3 + $0x1], 0  ;;  %s3876_s6 = smov 0   ;;  %s3878_s7 = smov 0  }
   0x2   :  { %s3880_s8 = smov 0   ;;  %s3882_s9 = smov 0  }
   0x3 LB: > { %s3897_s10 = sadd.s32 4294967295, %s3828_s9   ;;  %s3679_s11 = sadd.s32 4294967294, %s3828_s9   ;;  %s3828_s9 = sphi %s3882_s9, %s5996_s9   ;;  %s3824_s8 = sphi %s3880_s8, %s5995_s8   ;;  %s3820_s7 = sphi %s3878_s7, %s5994_s7   ;;  %s3816_s6 = sphi %s3876_s6, %s5993_s6  }
   0x4   : > { %s3901_s12 = sadd.s32 1, %s3828_s9   ;;  %s47_s13 = sadd.s32 1, %s3824_s8 }
   0x5   : > { %s44_s14 = ssub.s32 %s3828_s9, %s3901_s12  ;;  %p57_p0 = scmp.ne.s32.totalorder %s3824_s8, %s3820_s7 }
   0x6   : > { %p45_p1 = scmp.eq.s32.totalorder %s44_s14, 0  ;;  %p58_p2 = scmp.eq.s32.totalorder %s3897_s10, 1 }
   0x7   : > { %p63_p3 = scmp.ne.s32.totalorder %s3820_s7, %s3816_s6  ;;  %p64_p4 = scmp.eq.s32.totalorder %s3679_s11, 1 }
   0x8   : > { %s3912_s15 = scalar_select %p45_p1, %s3824_s8, %s47_s13  }
   0x9   : > { %p3914_p5 = por %p58_p2, %p57_p0  ;;  %p3918_p6 = por %p64_p4, %p63_p3 }
   0xa   : > { %p3682_p7 = scmp.ge.s32.totalorder %s3828_s9, 1  ;;  %p91_p8 = scmp.lt.s32.totalorder %s3828_s9, 3 }
   0xc   : > { %p92_p9 = pnand %p3682_p7, %p91_p8 }
   0xe   : > { %95 = sbr.rel (%p92_p9) target bundleno = 898 (0x382), region = 24 }
  0x15   : > { %s3684_s18 = sshll.u32 %s3897_s10, 2  ;;  %v122_v0 = vlaneseq  ;;  %v3830_v60 = vmov 1983009808   ;;  %s3832_s23 = smov 2   ;;  %vm3402_vm0 = vcmask 15360   ;;  %vm3407_vm1 = vcmask 31744  }
  0x16   : > { %p112_p10 = scmp.lt.s32.totalorder %s3684_s18, 7  ;;  %v733_v61 = vunpack.c.l.s4 %v3830_v60  ;;  %s3833_s24 = smov 4   ;;  %vm3412_vm2 = vcmask 48128   ;;  %vm3417_vm3 = vcmask 64512   ;;  %vm3422_vm4 = vcmask 80896  }
  0x17   : > { %v3925_v1 = vshrl.u32 %v122_v0, 7  ;;  %s3834_s25 = smov 6   ;;  %s3835_s26 = smov 8   ;;  %vm3427_vm5 = vcmask 97280   ;;  %vm3432_vm6 = vcmask 113664   ;;  %vm3437_vm7 = vcmask 130048  }
  0x18   : > { %s5998_s18 = smov (!%p112_p10, %s3684_s18), 7  ;;  %s3836_s27 = smov 10   ;;  %vm3442_vm8 = vcmask 146432   ;;  %vm3447_vm9 = vcmask 162816   ;;  %vm3452_vm10 = vcmask 179200   ;;  %vm3457_vm11 = vcmask 195584  }
  0x19   : > { %v3928_v2 = vsub.s32 0, %v3925_v1  ;;  %s3685_s19 = sshll.u32 %s5998_s18, 3  ;;  %v3938_v5 = vsub.s32 1, %v3925_v1  ;;  %v3942_v7 = vsub.s32 2, %v3925_v1  ;;  %v3946_v9 = vsub.s32 3, %v3925_v1  ;;  %s3837_s28 = smov 12  }
  0x1a   : > { %s3933_s22 = scalar_lea.vmem %s5697_s0, %s3685_s19  ;;  %v3950_v11 = vsub.s32 4, %v3925_v1  ;;  %v3954_v13 = vsub.s32 5, %v3925_v1  ;;  %v3958_v15 = vsub.s32 6, %v3925_v1  ;;  %v3962_v17 = vsub.s32 7, %v3925_v1  ;;  %s3838_s29 = smov 14  }
  0x1b   : > { %v118_v3 = vld [vmem:[%s3933_s22] sm:$0xff]  ;;  %v119_v19 = vld [vmem:[%s3933_s22 + $0x8] sm:$0xff]  ;;  %v3983_v32 = vld [vmem:[%s3933_s22 + $0x10] sm:$0xff]  ;;  %s3839_s30 = smov 16   ;;  %s3840_s2 = smov 18   ;;  %vm3462_vm12 = vcmask 211968  }
  0x1c   : > { %v125_v4 = vrot.slane %v118_v3, %v3928_v2  ;;  %v144_v6 = vrot.slane %v118_v3, %v3938_v5  ;;  %v163_v8 = vrot.slane %v118_v3, %v3942_v7  ;;  %v182_v10 = vrot.slane %v118_v3, %v3946_v9  ;;  %s3841_s3 = smov 20   ;;  %s3842_s4 = smov 22  }
  0x1d   : > { %v201_v12 = vrot.slane %v118_v3, %v3950_v11  ;;  %v220_v14 = vrot.slane %v118_v3, %v3954_v13  ;;  %v239_v16 = vrot.slane %v118_v3, %v3958_v15  ;;  %v258_v18 = vrot.slane %v118_v3, %v3962_v17  ;;  %s3843_s5 = smov 24   ;;  %s3844_s11 = smov 26  }
  0x1e   : > { %135 = vbcast.lane.b32.xlu1 %v125_v4, 272  ;;  %127 = vbcast.lane.b32.xlu0 %v125_v4, 256  ;;  %v277_v20 = vrot.slane %v119_v19, %v3928_v2  ;;  %v296_v21 = vrot.slane %v119_v19, %v3938_v5  ;;  %v315_v22 = vrot.slane %v119_v19, %v3942_v7  ;;  %v734_v3 = vunpack.c.0.s8 %v733_v61  ;;  %s3845_s13 = smov 28   ;;  %s3846_s14 = smov 30  }
  0x1f   : > { %v334_v23 = vrot.slane %v119_v19, %v3946_v9  ;;  %v353_v24 = vrot.slane %v119_v19, %v3950_v11  ;;  %v372_v25 = vrot.slane %v119_v19, %v3954_v13  ;;  %v391_v26 = vrot.slane %v119_v19, %v3958_v15  ;;  %s3847_s18 = smov 32   ;;  %s3848_s19 = smov 34  }
  0x20   : > { %v410_v29 = vrot.slane %v119_v19, %v3962_v17  ;;  %v429_v35 = vrot.slane %v3983_v32, %v3928_v2  ;;  %v448_v40 = vrot.slane %v3983_v32, %v3938_v5  ;;  %v467_v45 = vrot.slane %v3983_v32, %v3942_v7  ;;  %s3849_s20 = smov 36   ;;  %s3850_s21 = smov 38  }
  0x21   : > { %v486_v50 = vrot.slane %v3983_v32, %v3946_v9  ;;  %v505_v55 = vrot.slane %v3983_v32, %v3950_v11  ;;  %v524_v62 = vrot.slane %v3983_v32, %v3954_v13  ;;  %v562_v60 = vrot.slane %v3983_v32, %v3962_v17 }
  0x22   : > { %139 = vbcast.lane.b32.xlu1 %v125_v4, 280  ;;  %131 = vbcast.lane.b32.xlu0 %v125_v4, 264  ;;  %v3831_v4 = vmov 1934713408   ;;  %vm3467_vm13 = vcmask 228352   ;;  %vm5783_vm14 = vcmask 244736  }
  0x23   : > { %vm3477_vm15 = vcmask 261120  }
  0x26   : > { %150 = vbcast.lane.b32.xlu1 %v144_v6, 264  ;;  %146 = vbcast.lane.b32.xlu0 %v144_v6, 256 }
  0x2a   : > { %158 = vbcast.lane.b32.xlu1 %v144_v6, 280  ;;  %154 = vbcast.lane.b32.xlu0 %v144_v6, 272  ;;  %v797_v6 = vunpack.c.l.s4 %v3831_v4 }
  0x2e   : > { %169 = vbcast.lane.b32.xlu1 %v163_v8, 264  ;;  %165 = vbcast.lane.b32.xlu0 %v163_v8, 256 }
  0x32   : > { %177 = vbcast.lane.b32.xlu1 %v163_v8, 280  ;;  %173 = vbcast.lane.b32.xlu0 %v163_v8, 272 }
  0x36   : > { %188 = vbcast.lane.b32.xlu1 %v182_v10, 264  ;;  %184 = vbcast.lane.b32.xlu0 %v182_v10, 256 }
  0x3a   : > { %196 = vbcast.lane.b32.xlu1 %v182_v10, 280  ;;  %192 = vbcast.lane.b32.xlu0 %v182_v10, 272 }
  0x3e   : > { %207 = vbcast.lane.b32.xlu1 %v201_v12, 264  ;;  %203 = vbcast.lane.b32.xlu0 %v201_v12, 256 }
  0x42   : > { %215 = vbcast.lane.b32.xlu1 %v201_v12, 280  ;;  %211 = vbcast.lane.b32.xlu0 %v201_v12, 272 }
  0x46   : > { %226 = vbcast.lane.b32.xlu1 %v220_v14, 264  ;;  %222 = vbcast.lane.b32.xlu0 %v220_v14, 256 }
  0x4a   : > { %234 = vbcast.lane.b32.xlu1 %v220_v14, 280  ;;  %230 = vbcast.lane.b32.xlu0 %v220_v14, 272 }
  0x4e   : > { %245 = vbcast.lane.b32.xlu1 %v239_v16, 264  ;;  %241 = vbcast.lane.b32.xlu0 %v239_v16, 256 }
  0x52   : > { %253 = vbcast.lane.b32.xlu1 %v239_v16, 280  ;;  %249 = vbcast.lane.b32.xlu0 %v239_v16, 272  ;;  %v4054_v16 = vsub.s32 %v734_v3, %v3925_v1 }
  0x56   : > { %264 = vbcast.lane.b32.xlu1 %v258_v18, 264  ;;  %260 = vbcast.lane.b32.xlu0 %v258_v18, 256 }
  0x5a   : > { %272 = vbcast.lane.b32.xlu1 %v258_v18, 280  ;;  %268 = vbcast.lane.b32.xlu0 %v258_v18, 272 }
  0x5e   : > { %283 = vbcast.lane.b32.xlu1 %v277_v20, 264  ;;  %279 = vbcast.lane.b32.xlu0 %v277_v20, 256 }
  0x62   : > { %291 = vbcast.lane.b32.xlu1 %v277_v20, 280  ;;  %287 = vbcast.lane.b32.xlu0 %v277_v20, 272  ;;  %v543_v20 = vrot.slane %v3983_v32, %v3958_v15 }
  0x66   : > { %302 = vbcast.lane.b32.xlu1 %v296_v21, 264  ;;  %298 = vbcast.lane.b32.xlu0 %v296_v21, 256 }
  0x6a   : > { %310 = vbcast.lane.b32.xlu1 %v296_v21, 280  ;;  %306 = vbcast.lane.b32.xlu0 %v296_v21, 272 }
  0x6e   : > { %321 = vbcast.lane.b32.xlu1 %v315_v22, 264  ;;  %317 = vbcast.lane.b32.xlu0 %v315_v22, 256 }
  0x72   : > { %329 = vbcast.lane.b32.xlu1 %v315_v22, 280  ;;  %325 = vbcast.lane.b32.xlu0 %v315_v22, 272  ;;  %v798_v22 = vunpack.c.0.s8 %v797_v6  ;;  %v4104_v6 = vld [vmem:[%s3933_s22 + $0x18] sm:$0xff]  ;;  %s3851_s22 = smov 40  }
  0x76   : > { %340 = vbcast.lane.b32.xlu1 %v334_v23, 264  ;;  %336 = vbcast.lane.b32.xlu0 %v334_v23, 256 }
  0x7a   : > { %348 = vbcast.lane.b32.xlu1 %v334_v23, 280  ;;  %344 = vbcast.lane.b32.xlu0 %v334_v23, 272 }
  0x7e   : > { %359 = vbcast.lane.b32.xlu1 %v353_v24, 264  ;;  %355 = vbcast.lane.b32.xlu0 %v353_v24, 256 }
  0x82   : > { %367 = vbcast.lane.b32.xlu1 %v353_v24, 280  ;;  %363 = vbcast.lane.b32.xlu0 %v353_v24, 272 }
  0x86   : > { %378 = vbcast.lane.b32.xlu1 %v372_v25, 264  ;;  %374 = vbcast.lane.b32.xlu0 %v372_v25, 256 }
  0x8a   : > { %386 = vbcast.lane.b32.xlu1 %v372_v25, 280  ;;  %382 = vbcast.lane.b32.xlu0 %v372_v25, 272 }
  0x8e   : > { %397 = vbcast.lane.b32.xlu1 %v391_v26, 264  ;;  %393 = vbcast.lane.b32.xlu0 %v391_v26, 256 }
  0x90   : > { %v3973_v27 = vpop.permute.xlu1 %135  ;;  %v3975_v28 = vpop.permute.xlu0 %127 }
  0x91   : > { %5786 = vst [vmem:[#allocation5_spill] sm:$0xff] %v3973_v27 }
  0x92   : > { %405 = vbcast.lane.b32.xlu1 %v391_v26, 280  ;;  %401 = vbcast.lane.b32.xlu0 %v391_v26, 272 }
  0x94   : > { %v3978_v30 = vpop.permute.xlu1 %139  ;;  %v3980_v31 = vpop.permute.xlu0 %131 }
  0x95   : > { %5787 = vst [vmem:[#allocation6_spill] sm:$0xff] %v3978_v30 }
  0x96   : > { %416 = vbcast.lane.b32.xlu1 %v410_v29, 264  ;;  %412 = vbcast.lane.b32.xlu0 %v410_v29, 256 }
  0x98   : > { %v3985_v33 = vpop.permute.xlu1 %150  ;;  %v3987_v34 = vpop.permute.xlu0 %146 }
  0x9a   : > { %424 = vbcast.lane.b32.xlu1 %v410_v29, 280  ;;  %420 = vbcast.lane.b32.xlu0 %v410_v29, 272 }
  0x9c   : > { %v3991_v36 = vpop.permute.xlu1 %158  ;;  %v3993_v37 = vpop.permute.xlu0 %154 }
  0x9d   : > { %5788 = vst [vmem:[#allocation7_spill] sm:$0xff] %v3991_v36  ;;  %5789 = vst [vmem:[#allocation8_spill] sm:$0xff] %v3993_v37 }
  0x9e   : > { %435 = vbcast.lane.b32.xlu1 %v429_v35, 264  ;;  %431 = vbcast.lane.b32.xlu0 %v429_v35, 256 }
  0xa0   : > { %v3995_v38 = vpop.permute.xlu1 %169  ;;  %v3997_v39 = vpop.permute.xlu0 %165 }
  0xa1   : > { %v730_v19 = vcombine.low %v3975_v28, %v3997_v39 }
  0xa2   : > { %443 = vbcast.lane.b32.xlu1 %v429_v35, 280  ;;  %439 = vbcast.lane.b32.xlu0 %v429_v35, 272 }
  0xa3   : > { %v4076_v29 = vrot.slane %v730_v19, %v4054_v16 }
  0xa4   : > { %v4001_v41 = vpop.permute.xlu1 %177  ;;  %v4003_v42 = vpop.permute.xlu0 %173 }
  0xa5   : > { %5790 = vst [vmem:[#allocation9_spill] sm:$0xff] %v4001_v41  ;;  %5791 = vst [vmem:[#allocation10_spill] sm:$0xff] %v4003_v42 }
  0xa6   : > { %454 = vbcast.lane.b32.xlu1 %v448_v40, 264  ;;  %450 = vbcast.lane.b32.xlu0 %v448_v40, 256 }
  0xa8   : > { %v4005_v43 = vpop.permute.xlu1 %188  ;;  %v4007_v44 = vpop.permute.xlu0 %184 }
  0xa9   : > { %v746_v8 = vcombine.low %v3987_v34, %v4007_v44 }
  0xaa   : > { %462 = vbcast.lane.b32.xlu1 %v448_v40, 280  ;;  %458 = vbcast.lane.b32.xlu0 %v448_v40, 272  ;;  %v4081_v40 = vsub.s32 %v798_v22, %v3925_v1 }
  0xab   : > { %v4066_v23 = vrot.slane %v746_v8, %v4054_v16 }
  0xac   : > { %v4011_v46 = vpop.permute.xlu1 %196  ;;  %v4013_v47 = vpop.permute.xlu0 %192 }
  0xad   : > { %5792 = vst [vmem:[#allocation11_spill] sm:$0xff] %v4011_v46  ;;  %5793 = vst [vmem:[#allocation12_spill] sm:$0xff] %v4013_v47 }
  0xae   : > { %473 = vbcast.lane.b32.xlu1 %v467_v45, 264  ;;  %469 = vbcast.lane.b32.xlu0 %v467_v45, 256 }
  0xb0   : > { %v4015_v48 = vpop.permute.xlu1 %207  ;;  %v4017_v49 = vpop.permute.xlu0 %203 }
  0xb2   : > { %481 = vbcast.lane.b32.xlu1 %v467_v45, 280  ;;  %477 = vbcast.lane.b32.xlu0 %v467_v45, 272  ;;  %v794_v45 = vcombine.low %v4076_v29, %v4066_v23 }
  0xb4   : > { %v4021_v51 = vpop.permute.xlu1 %215  ;;  %v4023_v52 = vpop.permute.xlu0 %211  ;;  %v4099_v1 = vrot.slane %v794_v45, %v4081_v40 }
  0xb5   : > { %5794 = vst [vmem:[#allocation13_spill] sm:$0xff] %v4021_v51  ;;  %5795 = vst [vmem:[#allocation14_spill] sm:$0xff] %v4023_v52 }
  0xb6   : > { %492 = vbcast.lane.b32.xlu1 %v486_v50, 264  ;;  %488 = vbcast.lane.b32.xlu0 %v486_v50, 256  ;;  %5806 = vst [vmem:[#allocation25_spill] sm:$0xff] %v4099_v1 }
  0xb8   : > { %v4025_v53 = vpop.permute.xlu1 %226  ;;  %v4027_v54 = vpop.permute.xlu0 %222 }
  0xba   : > { %500 = vbcast.lane.b32.xlu1 %v486_v50, 280  ;;  %496 = vbcast.lane.b32.xlu0 %v486_v50, 272 }
  0xbc   : > { %v4031_v56 = vpop.permute.xlu1 %234  ;;  %v4033_v57 = vpop.permute.xlu0 %230 }
  0xbd   : > { %5796 = vst [vmem:[#allocation15_spill] sm:$0xff] %v4031_v56  ;;  %5797 = vst [vmem:[#allocation16_spill] sm:$0xff] %v4033_v57 }
  0xbe   : > { %511 = vbcast.lane.b32.xlu1 %v505_v55, 264  ;;  %507 = vbcast.lane.b32.xlu0 %v505_v55, 256 }
  0xc0   : > { %v4035_v58 = vpop.permute.xlu1 %245  ;;  %v4037_v59 = vpop.permute.xlu0 %241 }
  0xc1   : > { %v762_v10 = vcombine.low %v4017_v49, %v4037_v59 }
  0xc2   : > { %519 = vbcast.lane.b32.xlu1 %v505_v55, 280  ;;  %515 = vbcast.lane.b32.xlu0 %v505_v55, 272 }
  0xc3   : > { %v4069_v24 = vrot.slane %v762_v10, %v4054_v16  ;;  %v581_v10 = vrot.slane %v4104_v6, %v3928_v2 }
  0xc4   : > { %v4041_v63 = vpop.permute.xlu1 %253  ;;  %v4043_v0 = vpop.permute.xlu0 %249 }
  0xc5   : > { %5798 = vst [vmem:[#allocation17_spill] sm:$0xff] %v4041_v63  ;;  %5799 = vst [vmem:[#allocation18_spill] sm:$0xff] %v4043_v0 }
  0xc6   : > { %530 = vbcast.lane.b32.xlu1 %v524_v62, 264  ;;  %526 = vbcast.lane.b32.xlu0 %v524_v62, 256 }
  0xc8   : > { %v4049_v12 = vpop.permute.xlu1 %264  ;;  %v4051_v14 = vpop.permute.xlu0 %260 }
  0xc9   : > { %v778_v18 = vcombine.low %v4027_v54, %v4051_v14 }
  0xca   : > { %538 = vbcast.lane.b32.xlu1 %v524_v62, 280  ;;  %534 = vbcast.lane.b32.xlu0 %v524_v62, 272 }
  0xcb   : > { %v4063_v21 = vrot.slane %v778_v18, %v4054_v16 }
  0xcc   : > { %v4071_v25 = vpop.permute.xlu1 %272  ;;  %v4073_v26 = vpop.permute.xlu0 %268 }
  0xcd   : > { %5800 = vst [vmem:[#allocation19_spill] sm:$0xff] %v4071_v25  ;;  %5801 = vst [vmem:[#allocation20_spill] sm:$0xff] %v4073_v26  ;;  %v826_v35 = vcombine.low %v4069_v24, %v4063_v21 }
  0xce   : > { %549 = vbcast.lane.b32.xlu1 %v543_v20, 264  ;;  %545 = vbcast.lane.b32.xlu0 %v543_v20, 256 }
  0xcf   : > { %v4092_v61 = vrot.slane %v826_v35, %v4081_v40  ;;  %v600_v35 = vrot.slane %v4104_v6, %v3938_v5  ;;  %v619_v5 = vrot.slane %v4104_v6, %v3942_v7  ;;  %v638_v7 = vrot.slane %v4104_v6, %v3946_v9 }
  0xd0   : > { %v4085_v50 = vpop.permute.xlu1 %283  ;;  %v4087_v55 = vpop.permute.xlu0 %279 }
  0xd1   : > { %5802 = vst [vmem:[#allocation21_spill] sm:$0xff] %v4085_v50  ;;  %5803 = vst [vmem:[#allocation22_spill] sm:$0xff] %v4092_v61 }
  0xd2   : > { %557 = vbcast.lane.b32.xlu1 %v543_v20, 280  ;;  %553 = vbcast.lane.b32.xlu0 %v543_v20, 272 }
  0xd4   : > { %v4094_v62 = vpop.permute.xlu1 %291  ;;  %v4096_v3 = vpop.permute.xlu0 %287 }
  0xd5   : > { %5804 = vst [vmem:[#allocation23_spill] sm:$0xff] %v4094_v62  ;;  %5805 = vst [vmem:[#allocation24_spill] sm:$0xff] %v4096_v3 }
  0xd6   : > { %568 = vbcast.lane.b32.xlu1 %v562_v60, 264  ;;  %564 = vbcast.lane.b32.xlu0 %v562_v60, 256 }
  0xd8   : > { %v4106_v8 = vpop.permute.xlu1 %302  ;;  %v4108_v32 = vpop.permute.xlu0 %298 }
  0xd9   : > { %5807 = vst [vmem:[#allocation26_spill] sm:$0xff] %v4106_v8 }
  0xda   : > { %576 = vbcast.lane.b32.xlu1 %v562_v60, 280  ;;  %572 = vbcast.lane.b32.xlu0 %v562_v60, 272 }
  0xdc   : > { %v4112_v18 = vpop.permute.xlu1 %310  ;;  %v4114_v19 = vpop.permute.xlu0 %306 }
  0xdd   : > { %5808 = vst [vmem:[#allocation27_spill] sm:$0xff] %v4112_v18  ;;  %5809 = vst [vmem:[#allocation28_spill] sm:$0xff] %v4114_v19 }
  0xde   : > { %587 = vbcast.lane.b32.xlu1 %v581_v10, 264  ;;  %583 = vbcast.lane.b32.xlu0 %v581_v10, 256 }
  0xe0   : > { %v4116_v20 = vpop.permute.xlu1 %321  ;;  %v4118_v22 = vpop.permute.xlu0 %317 }
  0xe1   : > { %5810 = vst [vmem:[#allocation29_spill] sm:$0xff] %v4116_v20  ;;  %v866_v2 = vcombine.low %v4087_v55, %v4118_v22 }
  0xe2   : > { %595 = vbcast.lane.b32.xlu1 %v581_v10, 280  ;;  %591 = vbcast.lane.b32.xlu0 %v581_v10, 272 }
  0xe4   : > { %v4122_v45 = vpop.permute.xlu1 %329  ;;  %v4124_v4 = vpop.permute.xlu0 %325 }
  0xe5   : > { %5811 = vst [vmem:[#allocation30_spill] sm:$0xff] %v4122_v45  ;;  %5812 = vst [vmem:[#allocation31_spill] sm:$0xff] %v4124_v4  ;;  %v874_v45 = vrot.slane %v866_v2, %v4054_v16 }
  0xe6   : > { %606 = vbcast.lane.b32.xlu1 %v600_v35, 264  ;;  %602 = vbcast.lane.b32.xlu0 %v600_v35, 256 }
  0xe8   : > { %v4128_v60 = vpop.permute.xlu1 %340  ;;  %v4130_v18 = vpop.permute.xlu0 %336 }
  0xe9   : > { %5813 = vst [vmem:[#allocation32_spill] sm:$0xff] %v4128_v60  ;;  %v882_v62 = vcombine.low %v4108_v32, %v4130_v18 }
  0xea   : > { %614 = vbcast.lane.b32.xlu1 %v600_v35, 280  ;;  %610 = vbcast.lane.b32.xlu0 %v600_v35, 272 }
  0xeb   : > { %v890_v10 = vrot.slane %v882_v62, %v4054_v16 }
  0xec   : > { %v4138_v19 = vpop.permute.xlu1 %348  ;;  %v4140_v3 = vpop.permute.xlu0 %344 }
  0xed   : > { %5814 = vst [vmem:[#allocation33_spill] sm:$0xff] %v4138_v19  ;;  %5815 = vst [vmem:[#allocation34_spill] sm:$0xff] %v4140_v3  ;;  %v931_v4 = vcombine.high %v874_v45, %v890_v10  ;;  %v657_v3 = vrot.slane %v4104_v6, %v3950_v11 }
  0xee   : > { %625 = vbcast.lane.b32.xlu1 %v619_v5, 264  ;;  %621 = vbcast.lane.b32.xlu0 %v619_v5, 256 }
  0xf0   : > { %v4142_v56 = vpop.permute.xlu1 %359  ;;  %v4144_v25 = vpop.permute.xlu0 %355 }
  0xf1   : > { %5816 = vst [vmem:[#allocation35_spill] sm:$0xff] %v4142_v56 }
  0xf2   : > { %633 = vbcast.lane.b32.xlu1 %v619_v5, 280  ;;  %629 = vbcast.lane.b32.xlu0 %v619_v5, 272 }
  0xf4   : > { %v4148_v62 = vpop.permute.xlu1 %367  ;;  %v4150_v35 = vpop.permute.xlu0 %363 }
  0xf5   : > { %5817 = vst [vmem:[#allocation36_spill] sm:$0xff] %v4148_v62  ;;  %5818 = vst [vmem:[#allocation37_spill] sm:$0xff] %v4150_v35  ;;  %v676_v62 = vrot.slane %v4104_v6, %v3954_v13  ;;  %v695_v13 = vrot.slane %v4104_v6, %v3958_v15 }
  0xf6   : > { %644 = vbcast.lane.b32.xlu1 %v638_v7, 264  ;;  %640 = vbcast.lane.b32.xlu0 %v638_v7, 256 }
  0xf8   : > { %v4152_v2 = vpop.permute.xlu1 %378  ;;  %v4154_v19 = vpop.permute.xlu0 %374 }
  0xf9   : > { %5819 = vst [vmem:[#allocation38_spill] sm:$0xff] %v4152_v2 }
  0xfa   : > { %652 = vbcast.lane.b32.xlu1 %v638_v7, 280  ;;  %648 = vbcast.lane.b32.xlu0 %v638_v7, 272 }
  0xfc   : > { %v4158_v51 = vpop.permute.xlu1 %386  ;;  %v4160_v63 = vpop.permute.xlu0 %382 }
  0xfd   : > { %5820 = vst [vmem:[#allocation39_spill] sm:$0xff] %v4158_v51  ;;  %5821 = vst [vmem:[#allocation40_spill] sm:$0xff] %v4160_v63 }
  0xfe   : > { %663 = vbcast.lane.b32.xlu1 %v657_v3, 264  ;;  %659 = vbcast.lane.b32.xlu0 %v657_v3, 256 }
 0x100   : > { %v4162_v9 = vpop.permute.xlu1 %397  ;;  %v4164_v5 = vpop.permute.xlu0 %393 }
 0x101   : > { %5822 = vst [vmem:[#allocation41_spill] sm:$0xff] %v4162_v9  ;;  %v898_v11 = vcombine.low %v4144_v25, %v4164_v5 }
 0x102   : > { %671 = vbcast.lane.b32.xlu1 %v657_v3, 280  ;;  %667 = vbcast.lane.b32.xlu0 %v657_v3, 272 }
 0x104   : > { %v4168_v35 = vpop.permute.xlu1 %405  ;;  %v4170_v36 = vpop.permute.xlu0 %401 }
 0x105   : > { %5823 = vst [vmem:[#allocation42_spill] sm:$0xff] %v4168_v35  ;;  %5824 = vst [vmem:[#allocation43_spill] sm:$0xff] %v4170_v36  ;;  %v930_v35 = vcombine.low %v874_v45, %v890_v10  ;;  %v906_v36 = vrot.slane %v898_v11, %v4054_v16  ;;  %v4199_v45 = vrot.slane %v931_v4, %v4081_v40 }
 0x106   : > { %682 = vbcast.lane.b32.xlu1 %v676_v62, 264  ;;  %678 = vbcast.lane.b32.xlu0 %v676_v62, 256 }
 0x107   : > { %v4193_v15 = vrot.slane %v930_v35, %v4081_v40 }
 0x108   : > { %v4174_v7 = vpop.permute.xlu1 %416  ;;  %v4176_v51 = vpop.permute.xlu0 %412 }
 0x109   : > { %5825 = vst [vmem:[#allocation44_spill] sm:$0xff] %v4174_v7  ;;  %v914_v63 = vcombine.low %v4154_v19, %v4176_v51  ;;  %5828 = vst [vmem:[#allocation47_spill] sm:$0xff] %v4193_v15 }
 0x10a   : > { %690 = vbcast.lane.b32.xlu1 %v676_v62, 280  ;;  %686 = vbcast.lane.b32.xlu0 %v676_v62, 272 }
 0x10b   : > { %v922_v3 = vrot.slane %v914_v63, %v4054_v16 }
 0x10c   : > { %v4184_v46 = vpop.permute.xlu1 %424  ;;  %v4186_v30 = vpop.permute.xlu0 %420 }
 0x10d   : > { %5826 = vst [vmem:[#allocation45_spill] sm:$0xff] %v4184_v46  ;;  %5827 = vst [vmem:[#allocation46_spill] sm:$0xff] %v4186_v30  ;;  %v962_v41 = vcombine.low %v906_v36, %v922_v3  ;;  %v963_v37 = vcombine.high %v906_v36, %v922_v3  ;;  %v714_v36 = vrot.slane %v4104_v6, %v3962_v17 }
 0x10e   : > { %701 = vbcast.lane.b32.xlu1 %v695_v13, 264  ;;  %697 = vbcast.lane.b32.xlu0 %v695_v13, 256 }
 0x10f   : > { %v4196_v63 = vrot.slane %v962_v41, %v4081_v40  ;;  %v4202_v10 = vrot.slane %v963_v37, %v4081_v40 }
 0x110   : > { %v4188_v47 = vpop.permute.xlu1 %435  ;;  %v4190_v27 = vpop.permute.xlu0 %431 }
 0x111   : > { %5829 = vst [vmem:[#allocation48_spill] sm:$0xff] %v4196_v63  ;;  %v995_v62 = vcombine.high %v4193_v15, %v4196_v63 }
 0x112   : > { %709 = vbcast.lane.b32.xlu1 %v695_v13, 280  ;;  %705 = vbcast.lane.b32.xlu0 %v695_v13, 272  ;;  %v859_v13 = vcombine.high %v4099_v1, %v4092_v61 }
 0x114   : > { %v4212_v11 = vpop.permute.xlu1 %443  ;;  %v4214_v4 = vpop.permute.xlu0 %439 }
 0x115   : > { %5830 = vst [vmem:[#allocation49_spill] sm:$0xff] %v4212_v11  ;;  %5831 = vst [vmem:[#allocation50_spill] sm:$0xff] %v4214_v4 }
 0x116   : > { %720 = vbcast.lane.b32.xlu1 %v714_v36, 264  ;;  %716 = vbcast.lane.b32.xlu0 %v714_v36, 256 }
 0x118   : > { %v4216_v37 = vpop.permute.xlu1 %454  ;;  %v4218_v3 = vpop.permute.xlu0 %450 }
 0x11a   : > { %728 = vbcast.lane.b32.xlu1 %v714_v36, 280  ;;  %724 = vbcast.lane.b32.xlu0 %v714_v36, 272 }
 0x11c   : > { %v4220_v17 = vpop.permute.xlu1 %462  ;;  %v4222_v6 = vpop.permute.xlu0 %458 }
 0x11d   : > { %5832 = vst [vmem:[#allocation51_spill] sm:$0xff] %v4220_v17  ;;  %5833 = vst [vmem:[#allocation52_spill] sm:$0xff] %v4222_v6 }
 0x11e   : > { %2912 = vrot.lane.b32.xlu1 %v995_v62, %s3832_s23  ;;  %2910 = vrot.lane.b32.xlu0 %v859_v13, %s3832_s23 }
 0x120   : > { %v4230_v41 = vpop.permute.xlu1 %473  ;;  %v4232_v35 = vpop.permute.xlu0 %469 }
 0x124   : > { %v4234_v36 = vpop.permute.xlu1 %481  ;;  %v4236_v46 = vpop.permute.xlu0 %477 }
 0x125   : > { %5834 = vst [vmem:[#allocation53_spill] sm:$0xff] %v4234_v36  ;;  %5835 = vst [vmem:[#allocation54_spill] sm:$0xff] %v4236_v46 }
 0x128   : > { %v4238_v17 = vpop.permute.xlu1 %492  ;;  %v4240_v11 = vpop.permute.xlu0 %488 }
 0x129   : > { %v1018_v6 = vcombine.low %v4218_v3, %v4240_v11 }
 0x12c   : > { %v4242_v63 = vpop.permute.xlu0 %496  ;;  %v4244_v15 = vpop.permute.xlu1 %500 }
 0x12d   : > { %5836 = vst [vmem:[#allocation55_spill] sm:$0xff] %v4242_v63  ;;  %5837 = vst [vmem:[#allocation56_spill] sm:$0xff] %v4244_v15  ;;  %v1002_v15 = vcombine.low %v4190_v27, %v4232_v35 }
 0x130   : > { %v4246_v61 = vpop.permute.xlu0 %507  ;;  %v4248_v62 = vpop.permute.xlu1 %511 }
 0x134   : > { %v4250_v13 = vpop.permute.xlu0 %515  ;;  %v4252_v30 = vpop.permute.xlu1 %519 }
 0x135   : > { %5838 = vst [vmem:[#allocation57_spill] sm:$0xff] %v4250_v13  ;;  %5839 = vst [vmem:[#allocation58_spill] sm:$0xff] %v4252_v30  ;;  %v1026_v13 = vrot.slane %v1018_v6, %v4054_v16  ;;  %v795_v6 = vcombine.high %v4076_v29, %v4066_v23  ;;  %v779_v29 = vcombine.high %v4027_v54, %v4051_v14 }
 0x136   : > { %v731_v54 = vcombine.high %v3975_v28, %v3997_v39 }
 0x137   : > { %v809_v23 = vrot.slane %v795_v6, %v4081_v40 }
 0x138   : > { %v527_v1 = vpop.permute.xlu0 %526  ;;  %v4256_v4 = vpop.permute.xlu1 %530 }
 0x13c   : > { %v4254_v36 = vpop.permute.xlu0 %534  ;;  %v4264_v42 = vpop.permute.xlu1 %538 }
 0x13d   : > { %5840 = vst [vmem:[#allocation59_spill] sm:$0xff] %v4254_v36  ;;  %5842 = vst [vmem:[#allocation61_spill] sm:$0xff] %v4264_v42  ;;  %v1010_v36 = vrot.slane %v1002_v15, %v4054_v16  ;;  %v827_v42 = vcombine.high %v4069_v24, %v4063_v21 }
 0x13f   : > { %v1066_v56 = vcombine.low %v1010_v36, %v1026_v13  ;;  %v841_v21 = vrot.slane %v827_v42, %v4081_v40  ;;  %v1067_v24 = vcombine.high %v1010_v36, %v1026_v13  ;;  %v763_v42 = vcombine.high %v4017_v49, %v4037_v59 }
 0x140   : > { %v546_v46 = vpop.permute.xlu0 %545  ;;  %v4269_v9 = vpop.permute.xlu1 %549  ;;  %v793_v13 = vrot.slane %v779_v29, %v4054_v16  ;;  %v1019_v49 = vcombine.high %v4218_v3, %v4240_v11 }
 0x141   : > { %v1034_v2 = vcombine.low %v4246_v61, %v546_v46  ;;  %v4280_v20 = vrot.slane %v1066_v56, %v4081_v40  ;;  %v1081_v36 = vrot.slane %v1067_v24, %v4081_v40  ;;  %v1035_v59 = vcombine.high %v4246_v61, %v546_v46 }
 0x142   : > { %v745_v24 = vrot.slane %v731_v54, %v4054_v16  ;;  %v1033_v11 = vrot.slane %v1019_v49, %v4054_v16 }
 0x143   : > { %v1042_v8 = vrot.slane %v1034_v2, %v4054_v16  ;;  %5844 = vst [vmem:[#allocation63_spill] sm:$0xff] %v4280_v20  ;;  %v1049_v46 = vrot.slane %v1035_v59, %v4054_v16 }
 0x144   : > { %v4260_v63 = vpop.permute.xlu0 %553  ;;  %v4287_v2 = vpop.permute.xlu1 %557 }
 0x145   : > { %5841 = vst [vmem:[#allocation60_spill] sm:$0xff] %v4260_v63  ;;  %5846 = vst [vmem:[#allocation65_spill] sm:$0xff] %v4287_v2 }
 0x148   : > { %v565_v30 = vpop.permute.xlu0 %564 }
 0x149   : > { %v1050_v7 = vcombine.low %v527_v1, %v565_v30  ;;  %v1051_v6 = vcombine.high %v527_v1, %v565_v30  ;;  %v1003_v30 = vcombine.high %v4190_v27, %v4232_v35 }
 0x14b   : > { %v1058_v63 = vrot.slane %v1050_v7, %v4054_v16  ;;  %v1065_v1 = vrot.slane %v1051_v6, %v4054_v16  ;;  %v1017_v3 = vrot.slane %v1003_v30, %v4054_v16 }
 0x14c   : > { %v4273_v60 = vpop.permute.xlu0 %572 }
 0x14d   : > { %5843 = vst [vmem:[#allocation62_spill] sm:$0xff] %v4273_v60  ;;  %v1098_v50 = vcombine.low %v1042_v8, %v1058_v63  ;;  %v1099_v7 = vcombine.high %v1042_v8, %v1058_v63  ;;  %v747_v63 = vcombine.high %v3987_v34, %v4007_v44  ;;  %v777_v44 = vrot.slane %v763_v42, %v4054_v16 }
 0x14e   : > { %v1114_v42 = vcombine.low %v1049_v46, %v1065_v1  ;;  %v1082_v35 = vcombine.low %v1017_v3, %v1033_v11 }
 0x14f   : > { %v4283_v15 = vrot.slane %v1098_v50, %v4081_v40  ;;  %v860_v50 = vcombine.low %v809_v23, %v841_v21  ;;  %v1113_v26 = vrot.slane %v1099_v7, %v4081_v40  ;;  %v761_v34 = vrot.slane %v747_v63, %v4054_v16 }
 0x150   : > { %v4285_v57 = vpop.permute.xlu0 %583  ;;  %v842_v39 = vcombine.low %v777_v44, %v793_v13  ;;  %v1122_v49 = vrot.slane %v1114_v42, %v4081_v40  ;;  %v1090_v59 = vrot.slane %v1082_v35, %v4081_v40  ;;  %v1115_v35 = vcombine.high %v1049_v46, %v1065_v1 }
 0x151   : > { %5845 = vst [vmem:[#allocation64_spill] sm:$0xff] %v4283_v15  ;;  %v1131_v60 = vcombine.high %v4280_v20, %v4283_v15  ;;  %v1132_v7 = vcombine.low %v1081_v36, %v1113_v26  ;;  %v810_v63 = vcombine.low %v745_v24, %v761_v34  ;;  %v1133_v54 = vcombine.high %v1081_v36, %v1113_v26 }
 0x152   : > { %v850_v27 = vrot.slane %v842_v39, %v4081_v40  ;;  %v1134_v39 = vcombine.low %v1090_v59, %v1122_v49  ;;  %v1129_v1 = vrot.slane %v1115_v35, %v4081_v40 }
 0x153   : > { %2914 = vrot.lane.b32.xlu0 %v1131_v60, %s3832_s23  ;;  %v4305_v60 = vpop.permute.xlu1 %568 }
 0x154   : > { %v4294_v56 = vpop.permute.xlu0 %591 }
 0x155   : > { %5847 = vst [vmem:[#allocation66_spill] sm:$0xff] %v4294_v56 }
 0x157   : > { %2926 = vrot.lane.b32.xlu0 %v860_v50, %s3833_s24  ;;  %v4326_v29 = vpop.permute.xlu1 %576  ;;  %v861_v50 = vcombine.high %v809_v23, %v841_v21  ;;  %v818_v21 = vrot.slane %v810_v63, %v4081_v40 }
 0x158   : > { %v4311_v14 = vpop.permute.xlu0 %602  ;;  %5849 = vst [vmem:[#allocation68_spill] sm:$0xff] %v4326_v29 }
 0x159   : > { %v863_v63 = vcombine.high %v818_v21, %v850_v27 }
 0x15b   : > { %2930 = vrot.lane.b32.xlu0 %v1132_v7, %s3833_s24  ;;  %v4335_v6 = vpop.permute.xlu1 %587  ;;  %v862_v7 = vcombine.low %v818_v21, %v850_v27 }
 0x15c   : > { %v4321_v28 = vpop.permute.xlu0 %610  ;;  %5850 = vst [vmem:[#allocation69_spill] sm:$0xff] %v4335_v6 }
 0x15d   : > { %5848 = vst [vmem:[#allocation67_spill] sm:$0xff] %v4321_v28 }
 0x15f   : > { %2942 = vrot.lane.b32.xlu0 %v861_v50, %s3834_s25  ;;  %v4346_v36 = vpop.permute.xlu1 %595  ;;  %v843_v50 = vcombine.high %v777_v44, %v793_v13  ;;  %v1306_v13 = vcombine.low %v4015_v48, %v4035_v58 }
 0x160   : > { %v4331_v61 = vpop.permute.xlu0 %621  ;;  %5852 = vst [vmem:[#allocation71_spill] sm:$0xff] %v4346_v36  ;;  %v1083_v36 = vcombine.high %v1017_v3, %v1033_v11  ;;  %v1290_v11 = vcombine.low %v3985_v33, %v4005_v43  ;;  %v1274_v3 = vcombine.low %v3980_v31, %v3995_v38 }
 0x161   : > { %v857_v15 = vrot.slane %v843_v50, %v4081_v40  ;;  %v1314_v21 = vrot.slane %v1306_v13, %v4054_v16 }
 0x162   : > { %v1097_v46 = vrot.slane %v1083_v36, %v4081_v40  ;;  %v1594_v36 = vcombine.low %v4256_v4, %v4305_v60 }
 0x163   : > { %2946 = vrot.lane.b32.xlu0 %v1133_v54, %s3834_s25  ;;  %v811_v54 = vcombine.high %v745_v24, %v761_v34  ;;  %v4351_v8 = vpop.permute.xlu1 %606  ;;  %v1322_v34 = vcombine.low %v4025_v53, %v4049_v12 }
 0x164   : > { %v4339_v23 = vpop.permute.xlu0 %629  ;;  %5854 = vst [vmem:[#allocation73_spill] sm:$0xff] %v4351_v8  ;;  %v1136_v35 = vcombine.low %v1097_v46, %v1129_v1  ;;  %v1602_v28 = vrot.slane %v1594_v36, %v4054_v16 }
 0x165   : > { %5851 = vst [vmem:[#allocation70_spill] sm:$0xff] %v4339_v23 }
 0x167   : > { %2958 = vrot.lane.b32.xlu0 %v862_v7, %s3835_s26  ;;  %v1135_v7 = vcombine.high %v1090_v59, %v1122_v49  ;;  %v4365_v24 = vpop.permute.xlu1 %614  ;;  %v1330_v49 = vrot.slane %v1322_v34, %v4054_v16  ;;  %v1546_v59 = vcombine.low %v4188_v47, %v4230_v41  ;;  %v1282_v34 = vrot.slane %v1274_v3, %v4054_v16 }
 0x168   : > { %v4344_v26 = vpop.permute.xlu0 %640  ;;  %5856 = vst [vmem:[#allocation75_spill] sm:$0xff] %v4365_v24 }
 0x169   : > { %v1554_v56 = vrot.slane %v1546_v59, %v4054_v16 }
 0x16b   : > { %2962 = vrot.lane.b32.xlu0 %v1134_v39, %s3835_s26  ;;  %v825_v39 = vrot.slane %v811_v54, %v4081_v40  ;;  %v1578_v54 = vcombine.low %v4248_v62, %v4269_v9  ;;  %v4387_v13 = vpop.permute.xlu1 %625 }
 0x16c   : > { %v4349_v30 = vpop.permute.xlu0 %648  ;;  %5857 = vst [vmem:[#allocation76_spill] sm:$0xff] %v4387_v13 }
 0x16d   : > { %5853 = vst [vmem:[#allocation72_spill] sm:$0xff] %v4349_v30  ;;  %v864_v27 = vcombine.low %v825_v39, %v857_v15  ;;  %v865_v20 = vcombine.high %v825_v39, %v857_v15  ;;  %v1154_v39 = vcombine.low %v4311_v14, %v4344_v26 }
 0x16f   : > { %2974 = vrot.lane.b32.xlu0 %v863_v63, %s3836_s27  ;;  %v1562_v63 = vcombine.low %v4216_v37, %v4238_v17  ;;  %v4400_v29 = vpop.permute.xlu1 %633 }
 0x170   : > { %v4354_v42 = vpop.permute.xlu0 %659  ;;  %5859 = vst [vmem:[#allocation78_spill] sm:$0xff] %v4400_v29 }
 0x171   : > { %v1570_v23 = vrot.slane %v1562_v63, %v4054_v16 }
 0x173   : > { %2978 = vrot.lane.b32.xlu0 %v1135_v7, %s3836_s27  ;;  %v1298_v7 = vrot.slane %v1290_v11, %v4054_v16 }
 0x174   : > { %v4363_v44 = vpop.permute.xlu0 %667 }
 0x175   : > { %5855 = vst [vmem:[#allocation74_spill] sm:$0xff] %v4363_v44  ;;  %v1586_v44 = vrot.slane %v1578_v54, %v4054_v16  ;;  %v1338_v30 = vcombine.low %v1282_v34, %v1298_v7  ;;  %v1339_v13 = vcombine.high %v1282_v34, %v1298_v7  ;;  %v1307_v7 = vcombine.high %v4015_v48, %v4035_v58 }
 0x176   : > { %v1323_v34 = vcombine.high %v4025_v53, %v4049_v12  ;;  %v915_v48 = vcombine.high %v4154_v19, %v4176_v51  ;;  %v1275_v12 = vcombine.high %v3980_v31, %v3995_v38  ;;  %v883_v51 = vcombine.high %v4108_v32, %v4130_v18 }
 0x177   : > { %2990 = vrot.lane.b32.xlu0 %v864_v27, %s3837_s28  ;;  %v1370_v27 = vcombine.low %v1314_v21, %v1330_v49  ;;  %v1642_v3 = vcombine.low %v1586_v44, %v1602_v28  ;;  %v1346_v59 = vrot.slane %v1338_v30, %v4081_v40  ;;  %v1643_v0 = vcombine.high %v1586_v44, %v1602_v28 }
 0x178   : > { %v4378_v50 = vpop.permute.xlu0 %678  ;;  %v4463_v44 = vrot.slane %v1323_v34, %v4054_v16  ;;  %v1547_v31 = vcombine.high %v4188_v47, %v4230_v41  ;;  %v1579_v19 = vcombine.high %v4248_v62, %v4269_v9  ;;  %v1595_v32 = vcombine.high %v4256_v4, %v4305_v60 }
 0x179   : > { %v1378_v15 = vrot.slane %v1370_v27, %v4081_v40  ;;  %v1650_v29 = vrot.slane %v1642_v3, %v4081_v40  ;;  %v867_v47 = vcombine.high %v4087_v55, %v4118_v22  ;;  %v4502_v55 = vrot.slane %v883_v51, %v4054_v16 }
 0x17a   : > { %v1155_v62 = vcombine.high %v4311_v14, %v4344_v26  ;;  %v1139_v26 = vcombine.high %v4285_v57, %v4331_v61 }
 0x17b   : > { %2994 = vrot.lane.b32.xlu0 %v1136_v35, %s3837_s28  ;;  %v1610_v35 = vcombine.low %v1554_v56, %v1570_v23  ;;  %v1402_v54 = vcombine.low %v1346_v59, %v1378_v15 }
 0x17c   : > { %v4391_v24 = vpop.permute.xlu0 %686 }
 0x17d   : > { %5858 = vst [vmem:[#allocation77_spill] sm:$0xff] %v4391_v24  ;;  %v1137_v24 = vcombine.high %v1097_v46, %v1129_v1  ;;  %v1618_v36 = vrot.slane %v1610_v35, %v4081_v40  ;;  %v4413_v1 = vpop.permute.xlu1 %644  ;;  %v1162_v46 = vrot.slane %v1154_v39, %v4054_v16  ;;  %v1371_v39 = vcombine.high %v1314_v21, %v1330_v49 }
 0x17e   : > { %5861 = vst [vmem:[#allocation80_spill] sm:$0xff] %v4413_v1 }
 0x17f   : > { %3006 = vrot.lane.b32.xlu0 %v865_v20, %s3838_s29  ;;  %v1138_v20 = vcombine.low %v4285_v57, %v4331_v61  ;;  %v1674_v35 = vcombine.low %v1618_v36, %v1650_v29  ;;  %v5867_v57 = vcombine.high %v4199_v45, %v4202_v10 }
 0x180   : > { %v4398_v11 = vpop.permute.xlu0 %697 }
 0x181   : > { %v1170_v27 = vcombine.low %v4354_v42, %v4398_v11  ;;  %v4427_v1 = vpop.permute.xlu1 %652  ;;  %v1171_v60 = vcombine.high %v4354_v42, %v4398_v11 }
 0x182   : > { %5862 = vst [vmem:[#allocation81_spill] sm:$0xff] %v4427_v1  ;;  %v5897_v1 = vld [vmem:[#allocation54_spill] sm:$0xff] }
 0x183   : > { %3010 = vrot.lane.b32.xlu0 %v1137_v24, %s3838_s29  ;;  %v1146_v24 = vrot.slane %v1138_v20, %v4054_v16  ;;  %v1178_v3 = vrot.slane %v1170_v27, %v4054_v16  ;;  %v1385_v27 = vrot.slane %v1371_v39, %v4081_v40  ;;  %v4542_v39 = vrot.slane %v1155_v62, %v4054_v16 }
 0x184   : > { %v4407_v63 = vpop.permute.xlu0 %705 }
 0x185   : > { %5860 = vst [vmem:[#allocation79_spill] sm:$0xff] %v4407_v63  ;;  %v1202_v2 = vcombine.low %v1146_v24, %v1162_v46 }
 0x187   : > { %3022 = vrot.lane.b32.xlu0 %v1402_v54, %s3839_s30  ;;  %v1403_v54 = vcombine.high %v1346_v59, %v1378_v15  ;;  %v4431_v20 = vrot.slane %v1202_v2, %v4081_v40  ;;  %v4443_v2 = vpop.permute.xlu1 %663  ;;  %v1203_v15 = vcombine.high %v1146_v24, %v1162_v46  ;;  %v4522_v46 = vrot.slane %v1595_v32, %v4054_v16 }
 0x188   : > { %v4419_v30 = vpop.permute.xlu0 %716 }
 0x189   : > { %v1186_v63 = vcombine.low %v4378_v50, %v4419_v30  ;;  %5863 = vst [vmem:[#allocation82_spill] sm:$0xff] %v4431_v20  ;;  %v1217_v38 = vrot.slane %v1203_v15, %v4081_v40  ;;  %v1187_v41 = vcombine.high %v4378_v50, %v4419_v30  ;;  %v4513_v50 = vrot.slane %v1547_v31, %v4054_v16 }
 0x18a   : > { %v4525_v30 = vrot.slane %v867_v47, %v4054_v16 }
 0x18b   : > { %v1194_v8 = vrot.slane %v1186_v63, %v4054_v16  ;;  %3026 = vrot.lane.b32.xlu0 %v1674_v35, %s3839_s30  ;;  %v1611_v63 = vcombine.high %v1554_v56, %v1570_v23  ;;  %v1675_v35 = vcombine.high %v1618_v36, %v1650_v29  ;;  %v1291_v29 = vcombine.high %v3985_v33, %v4005_v43 }
 0x18c   : > { %v4460_v23 = vrot.slane %v1307_v7, %v4054_v16  ;;  %v5865_v33 = vcombine.low %v4199_v45, %v4202_v10  ;;  %v1563_v43 = vcombine.high %v4216_v37, %v4238_v17  ;;  %v4493_v37 = vrot.slane %v1275_v12, %v4054_v16 }
 0x18d   : > { %v1234_v6 = vcombine.low %v1178_v3, %v1194_v8  ;;  %v1235_v49 = vcombine.high %v1178_v3, %v1194_v8  ;;  %v1625_v28 = vrot.slane %v1611_v63, %v4081_v40  ;;  %v1657_v8 = vrot.slane %v1643_v0, %v4081_v40 }
 0x18e   : > { %v899_v0 = vcombine.high %v4144_v25, %v4164_v5  ;;  %v4483_v25 = vpop.permute.xlu1 %671  ;;  %v4488_v5 = vrot.slane %v915_v48, %v4054_v16  ;;  %v4496_v9 = vrot.slane %v1291_v29, %v4054_v16  ;;  %v1386_v4 = vcombine.low %v4460_v23, %v4463_v44 }
 0x18f   : > { %3038 = vrot.lane.b32.xlu0 %v1403_v54, %s3840_s2  ;;  %v4434_v52 = vrot.slane %v1234_v6, %v4081_v40  ;;  %v1353_v6 = vrot.slane %v1339_v13, %v4081_v40  ;;  %v1249_v58 = vrot.slane %v1235_v49, %v4081_v40  ;;  %5866 = vst [vmem:[#allocation84_spill] sm:$0xff] %v4483_v25 }
 0x190   : > { %v1676_v18 = vcombine.low %v1625_v28, %v1657_v8  ;;  %v4505_v22 = vrot.slane %v899_v0, %v4054_v16  ;;  %v4516_v59 = vrot.slane %v1563_v43, %v4054_v16  ;;  %v4519_v36 = vrot.slane %v1579_v19, %v4054_v16 }
 0x191   : > { %5864 = vst [vmem:[#allocation83_spill] sm:$0xff] %v4434_v52  ;;  %v1267_v21 = vcombine.high %v4431_v20, %v4434_v52  ;;  %v1404_v56 = vcombine.low %v1353_v6, %v1385_v27  ;;  %v1268_v13 = vcombine.low %v1217_v38, %v1249_v58  ;;  %v1405_v17 = vcombine.high %v1353_v6, %v1385_v27  ;;  %v4665_v52 = vpop.permute.xlu0 %724 }
 0x192   : > { %v978_v14 = vcombine.low %v4505_v22, %v4488_v5  ;;  %v4532_v42 = vrot.slane %v1187_v41, %v4054_v16  ;;  %v1354_v11 = vcombine.low %v4493_v37, %v4496_v9  ;;  %v4536_v24 = vpop.permute.xlu1 %682  ;;  %v946_v3 = vcombine.low %v4525_v30, %v4502_v55 }
 0x193   : > { %3042 = vrot.lane.b32.xlu0 %v1675_v35, %s3840_s2  ;;  %2916 = vrot.lane.b32.xlu1 %v1267_v21, %s3832_s23  ;;  %v4545_v54 = vrot.slane %v1171_v60, %v4054_v16  ;;  %v1626_v61 = vcombine.low %v4513_v50, %v4516_v59  ;;  %v1658_v27 = vcombine.low %v4519_v36, %v4522_v46  ;;  %v5874_v60 = vld [vmem:[#allocation29_spill] sm:$0xff]  ;;  %s3852_s23 = smov 42  }
 0x194   : > { %v1677_v63 = vcombine.high %v1625_v28, %v1657_v8  ;;  %v1394_v35 = vrot.slane %v1386_v4, %v4081_v40  ;;  %v4557_v21 = vrot.slane %v1139_v26, %v4054_v16  ;;  %v1269_v7 = vcombine.high %v1217_v38, %v1249_v58  ;;  %v5871_v4 = vld [vmem:[#allocation14_spill] sm:$0xff]  ;;  %v5878_v26 = vld [vmem:[#allocation41_spill] sm:$0xff] }
 0x195   : > { %v1250_v49 = vcombine.low %v4545_v54, %v4532_v42  ;;  %v986_v34 = vrot.slane %v978_v14, %v4081_v40  ;;  %v1362_v45 = vrot.slane %v1354_v11, %v4081_v40  ;;  %v954_v6 = vrot.slane %v946_v3, %v4081_v40 }
 0x196   : > { %v1218_v10 = vcombine.low %v4557_v21, %v4542_v39  ;;  %v4568_v15 = vpop.permute.xlu1 %690  ;;  %v1634_v28 = vrot.slane %v1626_v61, %v4081_v40  ;;  %v1666_v8 = vrot.slane %v1658_v27, %v4081_v40  ;;  %v1387_v31 = vcombine.high %v4460_v23, %v4463_v44  ;;  %v5881_v61 = vld [vmem:[#allocation38_spill] sm:$0xff] }
 0x197   : > { %3054 = vrot.lane.b32.xlu0 %v1404_v56, %s3841_s3  ;;  %2928 = vrot.lane.b32.xlu1 %v5865_v33, %s3833_s24  ;;  %5868 = vst [vmem:[#allocation85_spill] sm:$0xff] %v4568_v15  ;;  %v1406_v56 = vcombine.low %v1362_v45, %v1394_v35  ;;  %v998_v48 = vcombine.low %v954_v6, %v986_v34 }
 0x198   : > { %v1258_v58 = vrot.slane %v1250_v49, %v4081_v40  ;;  %v1226_v12 = vrot.slane %v1218_v10, %v4081_v40  ;;  %v1678_v29 = vcombine.low %v1634_v28, %v1666_v8  ;;  %v1407_v33 = vcombine.high %v1362_v45, %v1394_v35  ;;  %v5882_v45 = vld [vmem:[#allocation10_spill] sm:$0xff]  ;;  %v5883_v10 = vld [vmem:[#allocation5_spill] sm:$0xff] }
 0x199   : > { %v979_v38 = vcombine.high %v4505_v22, %v4488_v5  ;;  %v999_v43 = vcombine.high %v954_v6, %v986_v34  ;;  %v1355_v19 = vcombine.high %v4493_v37, %v4496_v9  ;;  %v947_v32 = vcombine.high %v4525_v30, %v4502_v55  ;;  %v5870_v9 = vld [vmem:[#allocation18_spill] sm:$0xff]  ;;  %v5872_v55 = vld [vmem:[#allocation20_spill] sm:$0xff] }
 0x19a   : > { %v1270_v51 = vcombine.low %v1226_v12, %v1258_v58  ;;  %v4576_v0 = vpop.permute.xlu1 %701  ;;  %v1659_v23 = vcombine.high %v4519_v36, %v4522_v46  ;;  %v1679_v47 = vcombine.high %v1634_v28, %v1666_v8  ;;  %v1401_v5 = vrot.slane %v1387_v31, %v4081_v40  ;;  %v5873_v22 = vld [vmem:[#allocation16_spill] sm:$0xff]  ;;  %v5877_v30 = vld [vmem:[#allocation26_spill] sm:$0xff]  ;;  %5896 = vst [vmem:[#allocation18_spill] sm:$0xff] %v4665_v52 }
 0x19b   : > { %3058 = vrot.lane.b32.xlu0 %v1676_v18, %s3841_s3  ;;  %2932 = vrot.lane.b32.xlu1 %v1268_v13, %s3833_s24  ;;  %v1627_v18 = vcombine.high %v4513_v50, %v4516_v59  ;;  %v1251_v41 = vcombine.high %v4545_v54, %v4532_v42  ;;  %v1271_v13 = vcombine.high %v1226_v12, %v1258_v58  ;;  %v5875_v50 = vld [vmem:[#allocation21_spill] sm:$0xff]  ;;  %v5876_v46 = vld [vmem:[#allocation32_spill] sm:$0xff]  ;;  %v5879_v42 = vld [vmem:[#allocation35_spill] sm:$0xff]  ;;  %s3853_s24 = smov 44  }
 0x19c   : > { %v993_v37 = vrot.slane %v979_v38, %v4081_v40  ;;  %v1866_v62 = vcombine.low %v5873_v22, %v5872_v55  ;;  %v1410_v59 = vcombine.low %v5875_v50, %v5874_v60  ;;  %v1369_v36 = vrot.slane %v1355_v19, %v4081_v40  ;;  %v5887_v38 = vld [vmem:[#allocation59_spill] sm:$0xff]  ;;  %v5888_v19 = vld [vmem:[#allocation76_spill] sm:$0xff] }
 0x19d   : > { %v1426_v14 = vcombine.low %v5877_v30, %v5876_v46  ;;  %v1442_v11 = vcombine.low %v5879_v42, %v5878_v26  ;;  %v1219_v3 = vcombine.high %v4557_v21, %v4542_v39  ;;  %v961_v54 = vrot.slane %v947_v32, %v4081_v40  ;;  %v5885_v39 = vld [vmem:[#allocation8_spill] sm:$0xff]  ;;  %v5889_v32 = vld [vmem:[#allocation69_spill] sm:$0xff] }
 0x19e   : > { %v4594_v44 = vpop.permute.xlu1 %709  ;;  %v1641_v35 = vrot.slane %v1627_v18, %v4081_v40  ;;  %v1673_v49 = vrot.slane %v1659_v23, %v4081_v40  ;;  %v1265_v34 = vrot.slane %v1251_v41, %v4081_v40  ;;  %v1818_v6 = vcombine.low %v5883_v10, %v5882_v45  ;;  %v5891_v41 = vld [vmem:[#allocation73_spill] sm:$0xff] }
 0x19f   : > { %3070 = vrot.lane.b32.xlu0 %v1405_v17, %s3842_s4  ;;  %2944 = vrot.lane.b32.xlu1 %v5867_v57, %s3834_s25  ;;  %5869 = vst [vmem:[#allocation86_spill] sm:$0xff] %v4594_v44  ;;  %v1850_v17 = vcombine.low %v5871_v4, %v5870_v9  ;;  %v5880_v57 = vld [vmem:[#allocation44_spill] sm:$0xff]  ;;  %v4629_v8 = vrot.slane %v1866_v62, %v4054_v16 }
 0x1a0   : > { %v1458_v27 = vcombine.low %v5881_v61, %v5880_v57  ;;  %v4635_v58 = vrot.slane %v1410_v59, %v4054_v16  ;;  %v4638_v12 = vrot.slane %v1426_v14, %v4054_v16  ;;  %v1682_v18 = vcombine.low %v5889_v32, %v5888_v19 }
 0x1a1   : > { %v4626_v28 = vrot.slane %v1850_v17, %v4054_v16  ;;  %v1680_v23 = vcombine.low %v1641_v35, %v1673_v49  ;;  %v1714_v17 = vcombine.low %v4443_v2, %v4576_v0  ;;  %v4669_v20 = vrot.slane %v1818_v6, %v4054_v16 }
 0x1a2   : > { %v4646_v31 = vrot.slane %v1458_v27, %v4054_v16  ;;  %v1409_v25 = vcombine.high %v1369_v36, %v1401_v5  ;;  %v1001_v6 = vcombine.high %v961_v54, %v993_v37 }
 0x1a3   : > { %3074 = vrot.lane.b32.xlu0 %v1677_v63, %s3842_s4  ;;  %2948 = vrot.lane.b32.xlu1 %v1269_v7, %s3834_s25  ;;  %v1408_v63 = vcombine.low %v1369_v36, %v1401_v5  ;;  %v1000_v7 = vcombine.low %v961_v54, %v993_v37  ;;  %v1914_v15 = vcombine.low %v4626_v28, %v4629_v8  ;;  %s3854_s25 = smov 46  }
 0x1a5   : > { %v1922_v54 = vrot.slane %v1914_v15, %v4081_v40 }
 0x1a7   : > { %3086 = vrot.lane.b32.xlu0 %v1406_v56, %s3843_s5  ;;  %2960 = vrot.lane.b32.xlu1 %v998_v48, %s3835_s26  ;;  %v5884_v56 = vld [vmem:[#allocation12_spill] sm:$0xff]  ;;  %v4631_v48 = vpop.permute.xlu1 %720 }
 0x1a8   : > { %v1834_v21 = vcombine.low %v5885_v39, %v5884_v56  ;;  %v1730_v62 = vcombine.low %v4536_v24, %v4631_v48 }
 0x1aa   : > { %v4659_v14 = vrot.slane %v1834_v21, %v4054_v16  ;;  %v1474_v21 = vcombine.low %v4635_v58, %v4638_v12  ;;  %v4693_v5 = vrot.slane %v1730_v62, %v4054_v16 }
 0x1ab   : > { %3090 = vrot.lane.b32.xlu0 %v1678_v29, %s3843_s5  ;;  %2964 = vrot.lane.b32.xlu1 %v1270_v51, %s3835_s26  ;;  %v4641_v29 = vrot.slane %v1442_v11, %v4054_v16  ;;  %v1233_v51 = vrot.slane %v1219_v3, %v4081_v40  ;;  %v5892_v11 = vld [vmem:[#allocation55_spill] sm:$0xff]  ;;  %v5893_v3 = vld [vmem:[#allocation52_spill] sm:$0xff] }
 0x1ac   : > { %v2106_v27 = vcombine.low %v5893_v3, %v5892_v11  ;;  %v4690_v11 = vrot.slane %v1714_v17, %v4054_v16  ;;  %v1882_v36 = vcombine.low %v4669_v20, %v4659_v14  ;;  %v1681_v17 = vcombine.high %v1641_v35, %v1673_v49 }
 0x1ad   : > { %v1272_v59 = vcombine.low %v1233_v51, %v1265_v34  ;;  %v1506_v44 = vcombine.low %v4641_v29, %v4646_v31  ;;  %v1482_v62 = vrot.slane %v1474_v21, %v4081_v40 }
 0x1af   : > { %3102 = vrot.lane.b32.xlu0 %v1407_v33, %s3844_s11  ;;  %2976 = vrot.lane.b32.xlu1 %v999_v43, %s3836_s27  ;;  %v5886_v33 = vld [vmem:[#allocation62_spill] sm:$0xff]  ;;  %v1514_v15 = vrot.slane %v1506_v44, %v4081_v40 }
 0x1b0   : > { %v2138_v43 = vcombine.low %v5887_v38, %v5886_v33 }
 0x1b3   : > { %3106 = vrot.lane.b32.xlu0 %v1679_v47, %s3844_s11  ;;  %2980 = vrot.lane.b32.xlu1 %v1271_v13, %s3836_s27  ;;  %v5890_v47 = vld [vmem:[#allocation80_spill] sm:$0xff]  ;;  %s3855_s27 = smov 48  }
 0x1b4   : > { %v1698_v13 = vcombine.low %v5891_v41, %v5890_v47 }
 0x1b6   : > { %v4687_v3 = vrot.slane %v1698_v13, %v4054_v16  ;;  %v4711_v13 = vpop.permute.xlu0 %2910 }
 0x1b7   : > { %3118 = vrot.lane.b32.xlu0 %v1408_v63, %s3845_s13  ;;  %2992 = vrot.lane.b32.xlu1 %v1000_v7, %s3837_s28  ;;  %v5894_v63 = vld [vmem:[#allocation60_spill] sm:$0xff]  ;;  %v5895_v7 = vld [vmem:[#allocation57_spill] sm:$0xff]  ;;  %5899 = vst [vmem:[#allocation14_spill] sm:$0xff] %v4711_v13  ;;  %v1538_v13 = vcombine.low %v1482_v62, %v1514_v15 }
 0x1b8   : > { %v2122_v53 = vcombine.low %v5895_v7, %v5894_v63  ;;  %v5898_v7 = vld [vmem:[#allocation50_spill] sm:$0xff]  ;;  %v4684_v63 = vrot.slane %v1682_v18, %v4054_v16 }
 0x1b9   : > { %v2090_v52 = vcombine.low %v5898_v7, %v5897_v1 }
 0x1ba   : > { %v4701_v37 = vrot.slane %v2122_v53, %v4054_v16  ;;  %v1746_v53 = vcombine.low %v4684_v63, %v4687_v3 }
 0x1bb   : > { %3122 = vrot.lane.b32.xlu0 %v1680_v23, %s3845_s13  ;;  %2996 = vrot.lane.b32.xlu1 %v1272_v59, %s3837_s28  ;;  %v4681_v23 = vrot.slane %v2138_v43, %v4054_v16  ;;  %v4698_v59 = vrot.slane %v2106_v27, %v4054_v16  ;;  %v4707_v43 = vrot.slane %v2090_v52, %v4054_v16  ;;  %s3856_s28 = smov 50  }
 0x1bc   : > { %v1273_v27 = vcombine.high %v1233_v51, %v1265_v34  ;;  %v1754_v7 = vrot.slane %v1746_v53, %v4081_v40  ;;  %v1475_v53 = vcombine.high %v4635_v58, %v4638_v12 }
 0x1bd   : > { %v2186_v18 = vcombine.low %v4701_v37, %v4681_v23  ;;  %v2154_v52 = vcombine.low %v4707_v43, %v4698_v59 }
 0x1bf   : > { %3134 = vrot.lane.b32.xlu0 %v1409_v25, %s3846_s14  ;;  %3008 = vrot.lane.b32.xlu1 %v1001_v6, %s3838_s29  ;;  %v1778_v25 = vcombine.low %v4690_v11, %v4693_v5  ;;  %v1890_v6 = vrot.slane %v1882_v36, %v4081_v40  ;;  %v2194_v21 = vrot.slane %v2186_v18, %v4081_v40 }
 0x1c0   : > { %v2162_v44 = vrot.slane %v2154_v52, %v4081_v40  ;;  %v1915_v18 = vcombine.high %v4626_v28, %v4629_v8  ;;  %v1539_v52 = vcombine.high %v1482_v62, %v1514_v15  ;;  %v2187_v28 = vcombine.high %v4701_v37, %v4681_v23 }
 0x1c1   : > { %v1946_v49 = vcombine.low %v1890_v6, %v1922_v54  ;;  %v1786_v34 = vrot.slane %v1778_v25, %v4081_v40  ;;  %v1851_v23 = vcombine.high %v5871_v4, %v5870_v9  ;;  %v2155_v37 = vcombine.high %v4707_v43, %v4698_v59 }
 0x1c2   : > { %v2218_v36 = vcombine.low %v2162_v44, %v2194_v21  ;;  %v2219_v58 = vcombine.high %v2162_v44, %v2194_v21  ;;  %v4753_v12 = vrot.slane %v1915_v18, %v4081_v40  ;;  %v1867_v15 = vcombine.high %v5873_v22, %v5872_v55 }
 0x1c3   : > { %3138 = vrot.lane.b32.xlu0 %v1681_v17, %s3846_s14  ;;  %3012 = vrot.lane.b32.xlu1 %v1273_v27, %s3838_s29  ;;  %v1810_v17 = vcombine.low %v1754_v7, %v1786_v34  ;;  %v1947_v27 = vcombine.high %v1890_v6, %v1922_v54  ;;  %v1459_v9 = vcombine.high %v5881_v61, %v5880_v57  ;;  %s3857_s29 = smov 52  }
 0x1c4   : > { %v2201_v55 = vrot.slane %v2187_v28, %v4081_v40  ;;  %v4797_v57 = vrot.slane %v1867_v15, %v4054_v16  ;;  %v1699_v6 = vcombine.high %v5891_v41, %v5890_v47  ;;  %v1715_v21 = vcombine.high %v4443_v2, %v4576_v0  ;;  %v5904_v41 = vld [vmem:[#allocation50_spill] sm:$0xff] }
 0x1c5   : > { %v4724_v35 = vpop.permute.xlu0 %2914 }
 0x1c6   : > { %v4855_v28 = vrot.slane %v1699_v6, %v4054_v16  ;;  %v5905_v6 = vld [vmem:[#allocation9_spill] sm:$0xff] }
 0x1c7   : > { %3150 = vrot.lane.b32.xlu0 %v1946_v49, %s3847_s18  ;;  %3024 = vrot.lane.b32.xlu1 %v1538_v13, %s3839_s30  ;;  %v1507_v13 = vcombine.high %v4641_v29, %v4646_v31  ;;  %v1883_v49 = vcombine.high %v4669_v20, %v4659_v14  ;;  %v4756_v29 = vrot.slane %v1475_v53, %v4081_v40 }
 0x1c8   : > { %v1747_v20 = vcombine.high %v4684_v63, %v4687_v3  ;;  %v1779_v31 = vcombine.high %v4690_v11, %v4693_v5  ;;  %v1811_v14 = vcombine.high %v1754_v7, %v1786_v34  ;;  %v1411_v3 = vcombine.high %v5875_v50, %v5874_v60 }
 0x1c9   : > { %v4732_v51 = vpop.permute.xlu0 %2926  ;;  %v1521_v54 = vrot.slane %v1507_v13, %v4081_v40  ;;  %v1897_v62 = vrot.slane %v1883_v49, %v4081_v40  ;;  %v1427_v11 = vcombine.high %v5877_v30, %v5876_v46  ;;  %v1443_v63 = vcombine.high %v5879_v42, %v5878_v26 }
 0x1ca   : > { %v1761_v60 = vrot.slane %v1747_v20, %v4081_v40  ;;  %v1793_v50 = vrot.slane %v1779_v31, %v4081_v40  ;;  %v1819_v46 = vcombine.high %v5883_v10, %v5882_v45  ;;  %v1835_v30 = vcombine.high %v5885_v39, %v5884_v56 }
 0x1cb   : > { %3154 = vrot.lane.b32.xlu0 %v2218_v36, %s3847_s18  ;;  %3028 = vrot.lane.b32.xlu1 %v1810_v17, %s3839_s30  ;;  %v1948_v7 = vcombine.low %v1897_v62, %v4753_v12  ;;  %v1540_v22 = vcombine.low %v4756_v29, %v1521_v54  ;;  %v4792_v26 = vrot.slane %v1851_v23, %v4054_v16  ;;  %s3858_s30 = smov 54  }
 0x1cc   : > { %v2169_v42 = vrot.slane %v2155_v37, %v4081_v40  ;;  %v4800_v61 = vrot.slane %v1411_v3, %v4054_v16  ;;  %v4803_v5 = vrot.slane %v1427_v11, %v4054_v16  ;;  %v4806_v45 = vrot.slane %v1443_v63, %v4054_v16 }
 0x1cd   : > { %v4740_v25 = vpop.permute.xlu0 %2930  ;;  %v4810_v10 = vrot.slane %v1459_v9, %v4054_v16  ;;  %v2139_v56 = vcombine.high %v5887_v38, %v5886_v33  ;;  %v1683_v39 = vcombine.high %v5889_v32, %v5888_v19  ;;  %v1731_v34 = vcombine.high %v4536_v24, %v4631_v48  ;;  %v5900_v33 = vld [vmem:[#allocation55_spill] sm:$0xff]  ;;  %v5901_v38 = vld [vmem:[#allocation52_spill] sm:$0xff]  ;;  %v5903_v32 = vld [vmem:[#allocation57_spill] sm:$0xff] }
 0x1ce   : > { %v2220_v43 = vcombine.low %v2169_v42, %v2201_v55  ;;  %v1812_v44 = vcombine.low %v1761_v60, %v1793_v50  ;;  %v4825_v36 = vrot.slane %v1835_v30, %v4054_v16  ;;  %v2107_v17 = vcombine.high %v5901_v38, %v5900_v33  ;;  %v5902_v19 = vld [vmem:[#allocation60_spill] sm:$0xff]  ;;  %v5908_v33 = vld [vmem:[#allocation7_spill] sm:$0xff] }
 0x1cf   : > { %3166 = vrot.lane.b32.xlu0 %v1947_v27, %s3848_s19  ;;  %3040 = vrot.lane.b32.xlu1 %v1539_v52, %s3840_s2  ;;  %v2123_v18 = vcombine.high %v5903_v32, %v5902_v19  ;;  %v4833_v47 = vrot.slane %v1819_v46, %v4054_v16  ;;  %v1930_v2 = vcombine.low %v4792_v26, %v4797_v57  ;;  %v5910_v19 = vld [vmem:[#allocation13_spill] sm:$0xff] }
 0x1d0   : > { %v1490_v24 = vcombine.low %v4800_v61, %v4803_v5  ;;  %v1949_v0 = vcombine.high %v1897_v62, %v4753_v12  ;;  %v1522_v48 = vcombine.low %v4806_v45, %v4810_v10  ;;  %v2091_v53 = vcombine.high %v5904_v41, %v5897_v1 }
 0x1d1   : > { %v4750_v8 = vpop.permute.xlu0 %2942  ;;  %v4846_v27 = vrot.slane %v2139_v56, %v4054_v16  ;;  %v1541_v52 = vcombine.high %v4756_v29, %v1521_v54  ;;  %v4852_v49 = vrot.slane %v1683_v39, %v4054_v16  ;;  %v4861_v12 = vrot.slane %v1731_v34, %v4054_v16 }
 0x1d2   : > { %v1898_v1 = vcombine.low %v4833_v47, %v4825_v36  ;;  %v4866_v20 = vrot.slane %v2107_v17, %v4054_v16  ;;  %v4869_v29 = vrot.slane %v2123_v18, %v4054_v16  ;;  %v1938_v31 = vrot.slane %v1930_v2, %v4081_v40  ;;  %v5909_v17 = vld [vmem:[#allocation17_spill] sm:$0xff]  ;;  %v5911_v18 = vld [vmem:[#allocation19_spill] sm:$0xff] }
 0x1d3   : > { %3170 = vrot.lane.b32.xlu0 %v2219_v58, %s3848_s19  ;;  %3044 = vrot.lane.b32.xlu1 %v1811_v14, %s3840_s2  ;;  %v4858_v58 = vrot.slane %v1715_v21, %v4054_v16  ;;  %v4875_v14 = vrot.slane %v2091_v53, %v4054_v16  ;;  %v2221_v37 = vcombine.high %v2169_v42, %v2201_v55  ;;  %v5906_v21 = vld [vmem:[#allocation6_spill] sm:$0xff]  ;;  %v5912_v2 = vld [vmem:[#allocation15_spill] sm:$0xff]  ;;  %s3859_s2 = smov 56  }
 0x1d4   : > { %v2202_v54 = vcombine.low %v4869_v29, %v4846_v27  ;;  %v1498_v62 = vrot.slane %v1490_v24, %v4081_v40  ;;  %v1762_v15 = vcombine.low %v4852_v49, %v4855_v28  ;;  %v1813_v11 = vcombine.high %v1761_v60, %v1793_v50 }
 0x1d5   : > { %v4780_v4 = vpop.permute.xlu0 %2946  ;;  %v1794_v3 = vcombine.low %v4858_v58, %v4861_v12  ;;  %v1530_v63 = vrot.slane %v1522_v48, %v4081_v40  ;;  %v2170_v9 = vcombine.low %v4875_v14, %v4866_v20  ;;  %v2362_v34 = vcombine.low %v5906_v21, %v5905_v6 }
 0x1d6   : > { %v2210_v46 = vrot.slane %v2202_v54, %v4081_v40  ;;  %v1770_v42 = vrot.slane %v1762_v15, %v4081_v40  ;;  %v2394_v32 = vcombine.low %v5910_v19, %v5909_v17  ;;  %v2410_v24 = vcombine.low %v5912_v2, %v5911_v18  ;;  %v5918_v15 = vld [vmem:[#allocation40_spill] sm:$0xff] }
 0x1d7   : > { %3182 = vrot.lane.b32.xlu0 %v1948_v7, %s3849_s20  ;;  %3056 = vrot.lane.b32.xlu1 %v1540_v22, %s3841_s3  ;;  %v1906_v7 = vrot.slane %v1898_v1, %v4081_v40  ;;  %v1542_v30 = vcombine.low %v1498_v62, %v1530_v63  ;;  %v1802_v60 = vrot.slane %v1794_v3, %v4081_v40 }
 0x1d8   : > { %v2178_v50 = vrot.slane %v2170_v9, %v4081_v40  ;;  %v1491_v48 = vcombine.high %v4800_v61, %v4803_v5  ;;  %v1523_v41 = vcombine.high %v4806_v45, %v4810_v10  ;;  %v1899_v1 = vcombine.high %v4833_v47, %v4825_v36  ;;  %v5913_v5 = vld [vmem:[#allocation31_spill] sm:$0xff]  ;;  %v5914_v45 = vld [vmem:[#allocation24_spill] sm:$0xff]  ;;  %v5915_v36 = vld [vmem:[#allocation34_spill] sm:$0xff] }
 0x1d9   : > { %v4816_v59 = vpop.permute.xlu0 %2958  ;;  %v1950_v22 = vcombine.low %v1906_v7, %v1938_v31  ;;  %v1543_v54 = vcombine.high %v1498_v62, %v1530_v63  ;;  %v4932_v61 = vrot.slane %v2410_v24, %v4054_v16  ;;  %v1954_v10 = vcombine.low %v5914_v45, %v5913_v5  ;;  %v5916_v47 = vld [vmem:[#allocation28_spill] sm:$0xff]  ;;  %v5917_v62 = vld [vmem:[#allocation46_spill] sm:$0xff]  ;;  %v5932_v45 = vld [vmem:[#allocation67_spill] sm:$0xff] }
 0x1da   : > { %v2222_v39 = vcombine.low %v2178_v50, %v2210_v46  ;;  %v2002_v3 = vcombine.low %v5918_v15, %v5917_v62  ;;  %v2203_v63 = vcombine.high %v4869_v29, %v4846_v27  ;;  %v2171_v24 = vcombine.high %v4875_v14, %v4866_v20  ;;  %v5924_v20 = vld [vmem:[#allocation51_spill] sm:$0xff] }
 0x1db   : > { %3186 = vrot.lane.b32.xlu0 %v2220_v43, %s3849_s20  ;;  %3060 = vrot.lane.b32.xlu1 %v1812_v44, %s3841_s3  ;;  %v1814_v43 = vcombine.low %v1770_v42, %v1802_v60  ;;  %v5907_v44 = vld [vmem:[#allocation11_spill] sm:$0xff]  ;;  %s3860_s3 = smov 58  }
 0x1dc   : > { %v2378_v38 = vcombine.low %v5908_v33, %v5907_v44  ;;  %v5933_v5 = vld [vmem:[#allocation79_spill] sm:$0xff] }
 0x1dd   : > { %v4848_v13 = vpop.permute.xlu0 %2962 }
 0x1df   : > { %3198 = vrot.lane.b32.xlu0 %v1949_v0, %s3850_s21  ;;  %3072 = vrot.lane.b32.xlu1 %v1541_v52, %s3842_s4  ;;  %v1931_v0 = vcombine.high %v4792_v26, %v4797_v57  ;;  %v1951_v52 = vcombine.high %v1906_v7, %v1938_v31  ;;  %v4926_v26 = vrot.slane %v2378_v38, %v4054_v16 }
 0x1e0   : > { %v4929_v57 = vrot.slane %v2394_v32, %v4054_v16  ;;  %v1970_v31 = vcombine.low %v5916_v47, %v5915_v36  ;;  %v2223_v7 = vcombine.high %v2178_v50, %v2210_v46  ;;  %v1913_v38 = vrot.slane %v1899_v1, %v4081_v40  ;;  %v5919_v46 = vld [vmem:[#allocation43_spill] sm:$0xff]  ;;  %v5920_v50 = vld [vmem:[#allocation37_spill] sm:$0xff]  ;;  %v5931_v36 = vld [vmem:[#allocation72_spill] sm:$0xff] }
 0x1e1   : > { %v4879_v23 = vpop.permute.xlu0 %2974  ;;  %v1986_v32 = vcombine.low %v5920_v50, %v5919_v46  ;;  %v4989_v1 = vrot.slane %v2203_v63, %v4081_v40  ;;  %v2185_v63 = vrot.slane %v2171_v24, %v4081_v40  ;;  %v5934_v50 = vld [vmem:[#allocation74_spill] sm:$0xff]  ;;  %v5044_v46 = vpop.permute.xlu1 %728 }
 0x1e2   : > { %v2458_v29 = vcombine.low %v4929_v57, %v4932_v61  ;;  %5935 = vst [vmem:[#allocation20_spill] sm:$0xff] %v5044_v46 }
 0x1e3   : > { %3202 = vrot.lane.b32.xlu0 %v2221_v37, %s3850_s21  ;;  %3076 = vrot.lane.b32.xlu1 %v1813_v11, %s3842_s4  ;;  %v4923_v37 = vrot.slane %v2362_v34, %v4054_v16  ;;  %v4943_v11 = vrot.slane %v1931_v0, %v4081_v40  ;;  %v1815_v34 = vcombine.high %v1770_v42, %v1802_v60  ;;  %v5921_v42 = vld [vmem:[#allocation53_spill] sm:$0xff]  ;;  %s3861_s4 = smov 60  }
 0x1e4   : > { %v5922_v60 = vld [vmem:[#allocation49_spill] sm:$0xff] }
 0x1e5   : > { %v4892_v55 = vpop.permute.xlu0 %2978  ;;  %v2426_v27 = vcombine.low %v4923_v37, %v4926_v26  ;;  %v2634_v0 = vcombine.low %v5922_v60, %v5921_v42 }
 0x1e7   : > { %3214 = vrot.lane.b32.xlu0 %v1950_v22, %s3851_s22  ;;  %3088 = vrot.lane.b32.xlu1 %v1542_v30, %s3843_s5  ;;  %v4950_v22 = vrot.slane %v1491_v48, %v4081_v40  ;;  %v4953_v30 = vrot.slane %v1523_v41, %v4081_v40  ;;  %v5923_v48 = vld [vmem:[#allocation56_spill] sm:$0xff] }
 0x1e8   : > { %v2650_v14 = vcombine.low %v5924_v20, %v5923_v48  ;;  %v5002_v20 = vrot.slane %v1986_v32, %v4054_v16  ;;  %v5007_v48 = vrot.slane %v2426_v27, %v4081_v40  ;;  %v5018_v32 = vrot.slane %v2634_v0, %v4054_v16 }
 0x1e9   : > { %v4900_v56 = vpop.permute.xlu0 %2990  ;;  %v2224_v27 = vcombine.low %v2185_v63, %v4989_v1 }
 0x1eb   : > { %3218 = vrot.lane.b32.xlu0 %v2222_v39, %s3851_s22  ;;  %3092 = vrot.lane.b32.xlu1 %v1814_v43, %s3843_s5  ;;  %v1763_v39 = vcombine.high %v4852_v49, %v4855_v28  ;;  %v1795_v43 = vcombine.high %v4858_v58, %v4861_v12  ;;  %v4970_v49 = vrot.slane %v1954_v10, %v4054_v16  ;;  %v5926_v10 = vld [vmem:[#allocation58_spill] sm:$0xff]  ;;  %s3862_s5 = smov 62  }
 0x1ec   : > { %v4973_v28 = vrot.slane %v1970_v31, %v4054_v16  ;;  %v4976_v58 = vrot.slane %v2002_v3, %v4054_v16  ;;  %v1952_v12 = vcombine.low %v1913_v38, %v4943_v11  ;;  %v5927_v3 = vld [vmem:[#allocation68_spill] sm:$0xff] }
 0x1ed   : > { %v4918_v53 = vpop.permute.xlu0 %2994  ;;  %v4996_v47 = vrot.slane %v1763_v39, %v4081_v40  ;;  %v4999_v60 = vrot.slane %v1795_v43, %v4081_v40 }
 0x1ee   : > { %v2018_v39 = vcombine.low %v4970_v49, %v4973_v28  ;;  %v2050_v43 = vcombine.low %v5002_v20, %v4976_v58 }
 0x1ef   : > { %3230 = vrot.lane.b32.xlu0 %v1951_v52, %s3852_s23  ;;  %3104 = vrot.lane.b32.xlu1 %v1543_v54, %s3844_s11  ;;  %v1544_v52 = vcombine.low %v4950_v22, %v4953_v30  ;;  %v5925_v54 = vld [vmem:[#allocation65_spill] sm:$0xff]  ;;  %v1816_v0 = vcombine.low %v4996_v47, %v4999_v60 }
 0x1f0   : > { %v2666_v31 = vcombine.low %v5926_v10, %v5925_v54  ;;  %v5010_v10 = vrot.slane %v2458_v29, %v4081_v40 }
 0x1f1   : > { %v4947_v9 = vpop.permute.xlu0 %3006 }
 0x1f2   : > { %v5027_v29 = vrot.slane %v2666_v31, %v4054_v16  ;;  %v2490_v42 = vcombine.low %v5007_v48, %v5010_v10  ;;  %v2242_v31 = vcombine.low %v5932_v45, %v5931_v36  ;;  %v1545_v45 = vcombine.high %v4950_v22, %v4953_v30 }
 0x1f3   : > { %3234 = vrot.lane.b32.xlu0 %v2223_v7, %s3852_s23  ;;  %3108 = vrot.lane.b32.xlu1 %v1815_v34, %s3844_s11  ;;  %v5928_v7 = vld [vmem:[#allocation61_spill] sm:$0xff]  ;;  %v2225_v22 = vcombine.high %v2185_v63, %v4989_v1  ;;  %s3863_s11 = smov 64  }
 0x1f4   : > { %v2682_v34 = vcombine.low %v5928_v7, %v5927_v3  ;;  %v5930_v3 = vld [vmem:[#allocation77_spill] sm:$0xff]  ;;  %v5074_v30 = vrot.slane %v2242_v31, %v4054_v16  ;;  %v5094_v31 = vpop.permute.xlu1 %2912 }
 0x1f5   : > { %v4984_v41 = vpop.permute.xlu0 %3010 }
 0x1f6   : > { %v5030_v7 = vrot.slane %v2682_v34, %v4054_v16  ;;  %v2258_v34 = vcombine.low %v5934_v50, %v5933_v5  ;;  %v5057_v50 = vrot.slane %v2050_v43, %v4081_v40  ;;  %v5939_v5 = vld [vmem:[#allocation64_spill] sm:$0xff] }
 0x1f7   : > { %3246 = vrot.lane.b32.xlu0 %v1952_v12, %s3853_s24  ;;  %3120 = vrot.lane.b32.xlu1 %v1544_v52, %s3845_s13  ;;  %v5021_v12 = vrot.slane %v2650_v14, %v4054_v16  ;;  %v5929_v52 = vld [vmem:[#allocation18_spill] sm:$0xff]  ;;  %v1953_v14 = vcombine.high %v1913_v38, %v4943_v11 }
 0x1f8   : > { %v2274_v54 = vcombine.low %v5930_v3, %v5929_v52  ;;  %v5048_v3 = vrot.slane %v2018_v39, %v4081_v40  ;;  %v5936_v38 = vld [vmem:[#allocation70_spill] sm:$0xff]  ;;  %v2730_v46 = vcombine.low %v5027_v29, %v5030_v7  ;;  %v5938_v39 = vld [vmem:[#allocation63_spill] sm:$0xff] }
 0x1f9   : > { %v5023_v24 = vpop.permute.xlu0 %3022  ;;  %v2698_v11 = vcombine.low %v5018_v32, %v5021_v12  ;;  %v5940_v36 = vcombine.low %v5938_v39, %v5939_v5  ;;  %v5941_v5 = vld [vmem:[#allocation14_spill] sm:$0xff] }
 0x1fb   : > { %3250 = vrot.lane.b32.xlu0 %v2224_v27, %s3853_s24  ;;  %3124 = vrot.lane.b32.xlu1 %v1816_v0, %s3845_s13  ;;  %v5937_v27 = vld [vmem:[#allocation66_spill] sm:$0xff]  ;;  %v5062_v0 = vrot.slane %v2274_v54, %v4054_v16  ;;  %v3405_v62 = vsel %vm3402_vm0, %v5940_v36, %v4724_v35  ;;  %v5077_v54 = vrot.slane %v2258_v34, %v4054_v16  ;;  %v5942_v36 = vld [vmem:[#allocation25_spill] sm:$0xff]  ;;  %s108_s13 = sand.u32 1, %s3820_s7  }
 0x1fc   : > { %v2226_v52 = vcombine.low %v5937_v27, %v5936_v38  ;;  %v3410_v27 = vsel %vm3407_vm1, %v3405_v62, %v4740_v25  ;;  %v5943_v62 = vld [vmem:[#allocation22_spill] sm:$0xff]  ;;  %v1817_v34 = vcombine.high %v4996_v47, %v4999_v60  ;;  %v2706_v39 = vrot.slane %v2698_v11, %v4081_v40 }
 0x1fd   : > { %v3027_v15 = vpop.permute.xlu0 %3026  ;;  %v3415_v35 = vsel %vm3412_vm2, %v3410_v27, %v4780_v4  ;;  %v5944_v43 = vcombine.low %v5942_v36, %v5943_v62  ;;  %v2322_v4 = vcombine.low %v5077_v54, %v5062_v0  ;;  %v2738_v11 = vrot.slane %v2730_v46, %v4081_v40 }
 0x1fe   : > { %v5083_v25 = vrot.slane %v2226_v52, %v4054_v16  ;;  %v3420_v63 = vsel %vm3417_vm3, %v3415_v35, %v4848_v13 }
 0x1ff   : > { %3262 = vrot.lane.b32.xlu0 %v1953_v14, %s3854_s25  ;;  %3136 = vrot.lane.b32.xlu1 %v1545_v45, %s3846_s14  ;;  %v3403_v1 = vsel %vm3402_vm0, %v5944_v43, %v5941_v5  ;;  %v3425_v52 = vsel %vm3422_vm4, %v3420_v63, %v4892_v55  ;;  %v2330_v5 = vrot.slane %v2322_v4, %v4081_v40 }
 0x200   : > { %v3408_v45 = vsel %vm3407_vm1, %v3403_v1, %v4732_v51  ;;  %v3430_v13 = vsel %vm3427_vm5, %v3425_v52, %v4918_v53  ;;  %v2290_v51 = vcombine.low %v5083_v25, %v5074_v30  ;;  %v2762_v62 = vcombine.low %v2706_v39, %v2738_v11 }
 0x201   : > { %v3039_v14 = vpop.permute.xlu0 %3038  ;;  %v3413_v27 = vsel %vm3412_vm2, %v3408_v45, %v4750_v8  ;;  %v3435_v47 = vsel %vm3432_vm6, %v3430_v13, %v4984_v41  ;;  %v2082_v41 = vcombine.low %v5048_v3, %v5057_v50  ;;  %v2051_v4 = vcombine.high %v5002_v20, %v4976_v58  ;;  %v5947_v13 = vld [vmem:[#allocation43_spill] sm:$0xff] }
 0x202   : > { %v3418_v55 = vsel %vm3417_vm3, %v3413_v27, %v4816_v59  ;;  %v3440_v53 = vsel %vm3437_vm7, %v3435_v47, %v3027_v15  ;;  %v2731_v58 = vcombine.high %v5027_v29, %v5030_v7  ;;  %v2763_v20 = vcombine.high %v2706_v39, %v2738_v11  ;;  %v5948_v39 = vld [vmem:[#allocation37_spill] sm:$0xff]  ;;  %v5950_v11 = vld [vmem:[#allocation24_spill] sm:$0xff] }
 0x203   : > { %3266 = vrot.lane.b32.xlu0 %v2225_v22, %s3854_s25  ;;  %3140 = vrot.lane.b32.xlu1 %v1817_v34, %s3846_s14  ;;  %v3423_v8 = vsel %vm3422_vm4, %v3418_v55, %v4879_v23  ;;  %v2083_v34 = vcombine.high %v5048_v3, %v5057_v50  ;;  %v2699_v50 = vcombine.high %v5018_v32, %v5021_v12  ;;  %v5945_v32 = vld [vmem:[#allocation46_spill] sm:$0xff]  ;;  %v5946_v12 = vld [vmem:[#allocation40_spill] sm:$0xff]  ;;  %s3683_s14 = sshll.u32 %s108_s13, 5 }
 0x204   : > { %v3428_v22 = vsel %vm3427_vm5, %v3423_v8, %v4900_v56  ;;  %v2298_v56 = vrot.slane %v2290_v51, %v4081_v40  ;;  %v2411_v3 = vcombine.high %v5912_v2, %v5911_v18  ;;  %v2003_v29 = vcombine.high %v5946_v12, %v5945_v32 }
 0x205   : > { %v3043_v60 = vpop.permute.xlu0 %3042  ;;  %v5121_v35 = vpop.permute.xlu1 %2916  ;;  %v3433_v23 = vsel %vm3432_vm6, %v3428_v22, %v4947_v9  ;;  %v5199_v2 = vrot.slane %v2699_v50, %v4081_v40  ;;  %v5202_v27 = vrot.slane %v2731_v58, %v4081_v40  ;;  %v5962_v50 = vld [vmem:[#allocation77_spill] sm:$0xff] }
 0x206   : > { %v3445_v59 = vsel %vm3442_vm8, %v3440_v53, %v3043_v60  ;;  %v3438_v15 = vsel %vm3437_vm7, %v3433_v23, %v5023_v24  ;;  %v2354_v9 = vcombine.low %v2298_v56, %v2330_v5  ;;  %v2459_v24 = vcombine.high %v4929_v57, %v4932_v61  ;;  %v5949_v60 = vld [vmem:[#allocation31_spill] sm:$0xff] }
 0x207   : > { %3278 = vrot.lane.b32.xlu0 %v2490_v42, %s3855_s27  ;;  %3152 = vrot.lane.b32.xlu1 %v2082_v41, %s3847_s18  ;;  %v3443_v46 = vsel %vm3442_vm8, %v3438_v15, %v3039_v14  ;;  %v2427_v42 = vcombine.high %v4923_v37, %v4926_v26  ;;  %v2491_v14 = vcombine.high %v5007_v48, %v5010_v10  ;;  %v5952_v41 = vld [vmem:[#allocation28_spill] sm:$0xff]  ;;  %v5953_v15 = vld [vmem:[#allocation53_spill] sm:$0xff] }
 0x208   : > { %v2363_v37 = vcombine.high %v5906_v21, %v5905_v6  ;;  %v2379_v26 = vcombine.high %v5908_v33, %v5907_v44  ;;  %v2019_v57 = vcombine.high %v4970_v49, %v4973_v28  ;;  %v5169_v6 = vrot.slane %v2459_v24, %v4081_v40  ;;  %v5958_v24 = vld [vmem:[#allocation58_spill] sm:$0xff] }
 0x209   : > { %v3055_v36 = vpop.permute.xlu0 %3054  ;;  %v5135_v43 = vpop.permute.xlu1 %2928  ;;  %v5162_v61 = vrot.slane %v2427_v42, %v4081_v40  ;;  %v2323_v21 = vcombine.high %v5077_v54, %v5062_v0  ;;  %v2355_v49 = vcombine.high %v2298_v56, %v2330_v5  ;;  %v5177_v28 = vrot.slane %v2051_v4, %v4081_v40  ;;  %v5954_v56 = vld [vmem:[#allocation49_spill] sm:$0xff] }
 0x20a   : > { %v3448_v1 = vsel %vm3447_vm9, %v3443_v46, %v3055_v36  ;;  %v2395_v10 = vcombine.high %v5910_v19, %v5909_v17  ;;  %v5185_v7 = vrot.slane %v2363_v37, %v4054_v16  ;;  %v2291_v0 = vcombine.high %v5083_v25, %v5074_v30  ;;  %v5957_v42 = vld [vmem:[#allocation65_spill] sm:$0xff] }
 0x20b   : > { %3282 = vrot.lane.b32.xlu0 %v2762_v62, %s3855_s27  ;;  %3156 = vrot.lane.b32.xlu1 %v2354_v9, %s3847_s18  ;;  %v2033_v54 = vrot.slane %v2019_v57, %v4081_v40  ;;  %v5194_v17 = vrot.slane %v2379_v26, %v4054_v16  ;;  %v2492_v18 = vcombine.low %v5162_v61, %v5169_v6  ;;  %v5955_v62 = vld [vmem:[#allocation56_spill] sm:$0xff]  ;;  %v5960_v4 = vld [vmem:[#allocation61_spill] sm:$0xff]  ;;  %v5961_v57 = vld [vmem:[#allocation18_spill] sm:$0xff] }
 0x20c   : > { %v1987_v30 = vcombine.high %v5948_v39, %v5947_v13  ;;  %v5211_v47 = vrot.slane %v2323_v21, %v4081_v40  ;;  %v5214_v8 = vrot.slane %v2395_v10, %v4054_v16  ;;  %v5217_v53 = vrot.slane %v2411_v3, %v4054_v16  ;;  %v5966_v13 = vld [vmem:[#allocation74_spill] sm:$0xff] }
 0x20d   : > { %v3059_v63 = vpop.permute.xlu0 %3058  ;;  %v5148_v45 = vpop.permute.xlu1 %2932  ;;  %v2084_v55 = vcombine.low %v2033_v54, %v5177_v28  ;;  %v1955_v22 = vcombine.high %v5950_v11, %v5949_v60  ;;  %v5225_v23 = vrot.slane %v2003_v29, %v4054_v16  ;;  %v2635_v46 = vcombine.high %v5954_v56, %v5953_v15  ;;  %v5963_v29 = vld [vmem:[#allocation72_spill] sm:$0xff]  ;;  %v5967_v11 = vld [vmem:[#allocation66_spill] sm:$0xff] }
 0x20e   : > { %v3450_v52 = vsel %vm3447_vm9, %v3445_v59, %v3059_v63  ;;  %v5951_v59 = vld [vmem:[#allocation34_spill] sm:$0xff]  ;;  %v2305_v36 = vrot.slane %v2291_v0, %v4081_v40  ;;  %v2667_v63 = vcombine.high %v5958_v24, %v5957_v42  ;;  %v2764_v37 = vcombine.low %v5199_v2, %v5202_v27  ;;  %v5964_v0 = vld [vmem:[#allocation67_spill] sm:$0xff] }
 0x20f   : > { %3294 = vrot.lane.b32.xlu0 %v2491_v14, %s3856_s28  ;;  %3168 = vrot.lane.b32.xlu1 %v2083_v34, %s3848_s19  ;;  %v1971_v5 = vcombine.high %v5952_v41, %v5951_v59  ;;  %v5959_v14 = vld [vmem:[#allocation68_spill] sm:$0xff]  ;;  %v5240_v26 = vrot.slane %v1987_v30, %v4054_v16  ;;  %v2275_v58 = vcombine.high %v5962_v50, %v5961_v57 }
 0x210   : > { %v2356_v21 = vcombine.low %v2305_v36, %v5211_v47  ;;  %v2474_v10 = vcombine.low %v5214_v8, %v5217_v53  ;;  %v5253_v3 = vrot.slane %v1955_v22, %v4054_v16  ;;  %v2493_v32 = vcombine.high %v5162_v61, %v5169_v6 }
 0x211   : > { %v3071_v48 = vpop.permute.xlu0 %3070  ;;  %v5173_v44 = vpop.permute.xlu1 %2944  ;;  %v5259_v12 = vrot.slane %v1971_v5, %v4054_v16  ;;  %v5269_v30 = vrot.slane %v2635_v46, %v4054_v16  ;;  %v5275_v61 = vrot.slane %v2667_v63, %v4054_v16  ;;  %v2227_v22 = vcombine.high %v5967_v11, %v5936_v38 }
 0x212   : > { %v3453_v33 = vsel %vm3452_vm10, %v3448_v1, %v3071_v48  ;;  %v5956_v1 = vld [vmem:[#allocation51_spill] sm:$0xff]  ;;  %v5283_v59 = vrot.slane %v2275_v58, %v4054_v16  ;;  %v2085_v15 = vcombine.high %v2033_v54, %v5177_v28 }
 0x213   : > { %3298 = vrot.lane.b32.xlu0 %v2763_v20, %s3856_s28  ;;  %3172 = vrot.lane.b32.xlu1 %v2355_v49, %s3848_s19  ;;  %v2651_v9 = vcombine.high %v5956_v1, %v5955_v62  ;;  %v2442_v49 = vcombine.low %v5185_v7, %v5194_v17  ;;  %v2034_v46 = vcombine.low %v5253_v3, %v5259_v12 }
 0x214   : > { %v5309_v24 = vrot.slane %v2227_v22, %v4054_v16 }
 0x215   : > { %v3075_v19 = vpop.permute.xlu0 %3074  ;;  %v5206_v25 = vpop.permute.xlu1 %2948  ;;  %v2450_v56 = vrot.slane %v2442_v49, %v4081_v40 }
 0x216   : > { %v3455_v51 = vsel %vm3452_vm10, %v3450_v52, %v3075_v19  ;;  %v2683_v52 = vcombine.high %v5960_v4, %v5959_v14  ;;  %v2243_v19 = vcombine.high %v5964_v0, %v5963_v29  ;;  %v2443_v0 = vcombine.high %v5185_v7, %v5194_v17 }
 0x217   : > { %3310 = vrot.lane.b32.xlu0 %v2492_v18, %s3857_s29  ;;  %3184 = vrot.lane.b32.xlu1 %v2084_v55, %s3849_s20  ;;  %v5965_v18 = vld [vmem:[#allocation79_spill] sm:$0xff]  ;;  %v5272_v55 = vrot.slane %v2651_v9, %v4054_v16  ;;  %v2765_v9 = vcombine.high %v5199_v2, %v5202_v27  ;;  %v2042_v2 = vrot.slane %v2034_v46, %v4081_v40 }
 0x218   : > { %v2259_v39 = vcombine.high %v5966_v13, %v5965_v18  ;;  %v5278_v6 = vrot.slane %v2683_v52, %v4054_v16  ;;  %v5294_v38 = vrot.slane %v2243_v19, %v4054_v16  ;;  %v2357_v52 = vcombine.high %v2305_v36, %v5211_v47 }
 0x219   : > { %v3087_v34 = vpop.permute.xlu0 %3086  ;;  %v5244_v48 = vpop.permute.xlu1 %2960  ;;  %v2714_v28 = vcombine.low %v5269_v30, %v5272_v55  ;;  %v2475_v19 = vcombine.high %v5214_v8, %v5217_v53  ;;  %v2035_v7 = vcombine.high %v5253_v3, %v5259_v12  ;;  %v2457_v17 = vrot.slane %v2443_v0, %v4081_v40  ;;  %v5979_v0 = vld [vmem:[#allocation75_spill] sm:$0xff] }
 0x21a   : > { %v3458_v20 = vsel %vm3457_vm11, %v3453_v33, %v3087_v34  ;;  %v2066_v33 = vcombine.low %v5240_v26, %v5225_v23  ;;  %v5297_v62 = vrot.slane %v2259_v39, %v4054_v16  ;;  %v2746_v54 = vcombine.low %v5275_v61, %v5278_v6 }
 0x21b   : > { %3314 = vrot.lane.b32.xlu0 %v2764_v37, %s3857_s29  ;;  %3188 = vrot.lane.b32.xlu1 %v2356_v21, %s3849_s20  ;;  %v2306_v34 = vcombine.low %v5309_v24, %v5294_v38  ;;  %v2722_v57 = vrot.slane %v2714_v28, %v4081_v40  ;;  %v2067_v39 = vcombine.high %v5240_v26, %v5225_v23  ;;  %v5969_v28 = vld [vmem:[#allocation23_spill] sm:$0xff]  ;;  %s3691_s20 = sshll.u32 %s3897_s10, 9 }
 0x21c   : > { %v2074_v42 = vrot.slane %v2066_v33, %v4081_v40  ;;  %v2338_v63 = vcombine.low %v5297_v62, %v5283_v59  ;;  %v2754_v50 = vrot.slane %v2746_v54, %v4081_v40  ;;  %v2715_v8 = vcombine.high %v5269_v30, %v5272_v55  ;;  %v5970_v55 = vld [vmem:[#allocation33_spill] sm:$0xff]  ;;  %v5971_v54 = vld [vmem:[#allocation27_spill] sm:$0xff] }
 0x21d   : > { %v3091_v60 = vpop.permute.xlu0 %3090  ;;  %v5285_v41 = vpop.permute.xlu1 %2964  ;;  %v2314_v21 = vrot.slane %v2306_v34, %v4081_v40  ;;  %v2747_v53 = vcombine.high %v5275_v61, %v5278_v6  ;;  %v2081_v46 = vrot.slane %v2067_v39, %v4081_v40  ;;  %v2514_v61 = vcombine.low %v5971_v54, %v5970_v55  ;;  %v5972_v6 = vld [vmem:[#allocation42_spill] sm:$0xff] }
 0x21e   : > { %v3460_v5 = vsel %vm3457_vm11, %v3455_v51, %v3091_v60  ;;  %v2482_v51 = vrot.slane %v2474_v10, %v4081_v40  ;;  %v2086_v47 = vcombine.low %v2042_v2, %v2074_v42  ;;  %v2346_v36 = vrot.slane %v2338_v63, %v4081_v40  ;;  %v5980_v39 = vld [vmem:[#allocation86_spill] sm:$0xff] }
 0x21f   : > { %3326 = vrot.lane.b32.xlu0 %v2493_v32, %s3858_s30  ;;  %3200 = vrot.lane.b32.xlu1 %v2085_v15, %s3850_s21  ;;  %v2766_v10 = vcombine.low %v2722_v57, %v2754_v50  ;;  %v2087_v22 = vcombine.high %v2042_v2, %v2074_v42  ;;  %v2767_v26 = vcombine.high %v2722_v57, %v2754_v50  ;;  %v5974_v42 = vld [vmem:[#allocation45_spill] sm:$0xff] }
 0x220   : > { %v2494_v37 = vcombine.low %v2450_v56, %v2482_v51  ;;  %v2358_v29 = vcombine.low %v2314_v21, %v2346_v36  ;;  %v2495_v13 = vcombine.high %v2450_v56, %v2482_v51  ;;  %v2339_v15 = vcombine.high %v5297_v62, %v5283_v59  ;;  %v5968_v51 = vld [vmem:[#allocation30_spill] sm:$0xff]  ;;  %v5975_v59 = vld [vmem:[#allocation39_spill] sm:$0xff] }
 0x221   : > { %v3103_v1 = vpop.permute.xlu0 %3102  ;;  %v5313_v14 = vpop.permute.xlu1 %2976  ;;  %v2359_v12 = vcombine.high %v2314_v21, %v2346_v36  ;;  %v2498_v30 = vcombine.low %v5969_v28, %v5968_v51  ;;  %v2546_v62 = vcombine.low %v5975_v59, %v5974_v42  ;;  %v2307_v63 = vcombine.high %v5309_v24, %v5294_v38 }
 0x222   : > { %v3463_v4 = vsel %vm3462_vm12, %v3458_v20, %v3103_v1  ;;  %v5973_v1 = vld [vmem:[#allocation36_spill] sm:$0xff]  ;;  %v2729_v2 = vrot.slane %v2715_v8, %v4081_v40  ;;  %v5383_v38 = vrot.slane %v2514_v61, %v4054_v16  ;;  %v5983_v8 = vld [vmem:[#allocation85_spill] sm:$0xff] }
 0x223   : > { %3330 = vrot.lane.b32.xlu0 %v2765_v9, %s3858_s30  ;;  %3204 = vrot.lane.b32.xlu1 %v2357_v52, %s3850_s21  ;;  %v2530_v9 = vcombine.low %v5973_v1, %v5972_v6  ;;  %v5389_v36 = vrot.slane %v2546_v62, %v4054_v16  ;;  %v2321_v21 = vrot.slane %v2307_v63, %v4081_v40 }
 0x225   : > { %v3107_v27 = vpop.permute.xlu0 %3106  ;;  %v5324_v58 = vpop.permute.xlu1 %2980  ;;  %v5386_v24 = vrot.slane %v2530_v9, %v4054_v16 }
 0x226   : > { %v3465_v20 = vsel %vm3462_vm12, %v3460_v5, %v3107_v27  ;;  %v2489_v5 = vrot.slane %v2475_v19, %v4081_v40  ;;  %v2761_v27 = vrot.slane %v2747_v53, %v4081_v40 }
 0x227   : > { %3342 = vrot.lane.b32.xlu0 %v2494_v37, %s3859_s2  ;;  %3216 = vrot.lane.b32.xlu1 %v2086_v47, %s3851_s22  ;;  %v5379_v47 = vrot.slane %v2498_v30, %v4054_v16  ;;  %v2594_v30 = vcombine.low %v5386_v24, %v5389_v36 }
 0x228   : > { %v2496_v34 = vcombine.low %v2457_v17, %v2489_v5  ;;  %v2497_v63 = vcombine.high %v2457_v17, %v2489_v5 }
 0x229   : > { %v3119_v49 = vpop.permute.xlu0 %3118  ;;  %v5331_v32 = vpop.permute.xlu1 %2992 }
 0x22a   : > { %v3468_v33 = vsel %vm3467_vm13, %v3463_v4, %v3119_v49  ;;  %v2049_v4 = vrot.slane %v2035_v7, %v4081_v40  ;;  %v5976_v49 = vld [vmem:[#allocation78_spill] sm:$0xff]  ;;  %v5982_v7 = vld [vmem:[#allocation20_spill] sm:$0xff] }
 0x22b   : > { %3346 = vrot.lane.b32.xlu0 %v2766_v10, %s3859_s2  ;;  %3220 = vrot.lane.b32.xlu1 %v2358_v29, %s3851_s22  ;;  %v5977_v10 = vld [vmem:[#allocation71_spill] sm:$0xff]  ;;  %v5978_v29 = vld [vmem:[#allocation81_spill] sm:$0xff]  ;;  %v2818_v53 = vcombine.low %v5983_v8, %v5982_v7 }
 0x22c   : > { %v2088_v50 = vcombine.low %v2049_v4, %v2081_v46  ;;  %v2786_v19 = vcombine.low %v5979_v0, %v5978_v29 }
 0x22d   : > { %v3123_v18 = vpop.permute.xlu0 %3122  ;;  %v5342_v60 = vpop.permute.xlu1 %2996 }
 0x22e   : > { %v3470_v11 = vsel %vm3467_vm13, %v3465_v20, %v3123_v18  ;;  %v2353_v20 = vrot.slane %v2339_v15, %v4081_v40  ;;  %v5412_v9 = vrot.slane %v2786_v19, %v4054_v16  ;;  %v5988_v19 = vld [vmem:[#allocation48_spill] sm:$0xff] }
 0x22f   : > { %3358 = vrot.lane.b32.xlu0 %v2495_v13, %s3860_s3  ;;  %3232 = vrot.lane.b32.xlu1 %v2087_v22, %s3852_s23  ;;  %v2768_v13 = vcombine.low %v2729_v2, %v2761_v27 }
 0x230   : > { %v2360_v15 = vcombine.low %v2321_v21, %v2353_v20 }
 0x231   : > { %v3135_v23 = vpop.permute.xlu0 %3134  ;;  %v5357_v56 = vpop.permute.xlu1 %3008 }
 0x232   : > { %v3473_v3 = vsel %vm5783_vm14, %v3468_v33, %v3135_v23  ;;  %v2770_v33 = vcombine.low %v5977_v10, %v5976_v49 }
 0x233   : > { %3362 = vrot.lane.b32.xlu0 %v2767_v26, %s3860_s3  ;;  %3236 = vrot.lane.b32.xlu1 %v2359_v12, %s3852_s23  ;;  %v2562_v12 = vcombine.low %v5379_v47, %v5383_v38  ;;  %s5650_s23 = scalar_lea.hbm %s5698_s1, %s3691_s20 }
 0x234   : > { %v5409_v61 = vrot.slane %v2770_v33, %v4054_v16 }
 0x235   : > { %v3139_v52 = vpop.permute.xlu0 %3138  ;;  %v3013_v37 = vpop.permute.xlu1 %3012  ;;  %v2570_v5 = vrot.slane %v2562_v12, %v4081_v40 }
 0x236   : > { %v3475_v57 = vsel %vm5783_vm14, %v3470_v11, %v3139_v52  ;;  %v5981_v11 = vld [vmem:[#allocation84_spill] sm:$0xff]  ;;  %v5418_v52 = vrot.slane %v2818_v53, %v4054_v16  ;;  %vm3482_vm14 = vcmask 277504  }
 0x237   : > { %3374 = vrot.lane.b32.xlu0 %v2496_v34, %s3861_s4  ;;  %3248 = vrot.lane.b32.xlu1 %v2088_v50, %s3853_s24  ;;  %v2802_v22 = vcombine.low %v5981_v11, %v5980_v39 }
 0x239   : > { %v3151_v18 = vpop.permute.xlu0 %3150  ;;  %v3025_v23 = vpop.permute.xlu1 %3024 }
 0x23a   : > { %v3478_v26 = vsel %vm3477_vm15, %v3473_v3, %v3151_v18  ;;  %v5415_v3 = vrot.slane %v2802_v22, %v4054_v16  ;;  %v2089_v18 = vcombine.high %v2049_v4, %v2081_v46  ;;  %v2834_v46 = vcombine.low %v5409_v61, %v5412_v9  ;;  %v5987_v4 = vld [vmem:[#allocation47_spill] sm:$0xff] }
 0x23b   : > { %3378 = vrot.lane.b32.xlu0 %v2768_v13, %s3861_s4  ;;  %3252 = vrot.lane.b32.xlu1 %v2360_v15, %s3853_s24  ;;  %v5984_v13 = vld [vmem:[#allocation82_spill] sm:$0xff]  ;;  %v5985_v15 = vld [vmem:[#allocation83_spill] sm:$0xff]  ;;  %s5655_s24 = scalar_lea.sflag [#allocation3], %s108_s13 }
 0x23c   : > { %v5986_v33 = vcombine.low %v5984_v13, %v5985_v15 }
 0x23d   : > { %v3155_v62 = vpop.permute.xlu0 %3154  ;;  %v3029_v34 = vpop.permute.xlu1 %3028 }
 0x23e   : > { %v3480_v50 = vsel %vm3477_vm15, %v3475_v57, %v3155_v62  ;;  %v3406_v8 = vsel %vm3402_vm0, %v5986_v33, %v5121_v35  ;;  %v2602_v57 = vrot.slane %v2594_v30, %v4081_v40  ;;  %v5989_v35 = vcombine.low %v5987_v4, %v5988_v19 }
 0x23f   : > { %3390 = vrot.lane.b32.xlu0 %v2497_v63, %s3862_s5  ;;  %v3411_v17 = vsel %vm3407_vm1, %v3406_v8, %v5148_v45  ;;  %3264 = vrot.lane.b32.xlu1 %v2089_v18, %s3854_s25  ;;  %v2769_v45 = vcombine.high %v2729_v2, %v2761_v27  ;;  %v2866_v8 = vcombine.low %v5415_v3, %v5418_v52 }
 0x240   : > { %v3404_v22 = vsel %vm3402_vm0, %v5989_v35, %v5094_v31  ;;  %v3416_v53 = vsel %vm3412_vm2, %v3411_v17, %v5206_v25  ;;  %v2361_v18 = vcombine.high %v2321_v21, %v2353_v20  ;;  %v2842_v21 = vrot.slane %v2834_v46, %v4081_v40 }
 0x241   : > { %v3167_v62 = vpop.permute.xlu0 %3166  ;;  %v3421_v12 = vsel %vm3417_vm3, %v3416_v53, %v5285_v41  ;;  %v3041_v30 = vpop.permute.xlu1 %3040  ;;  %v3409_v13 = vsel %vm3407_vm1, %v3404_v22, %v5135_v43  ;;  %v2626_v43 = vcombine.low %v2570_v5, %v2602_v57  ;;  %vm3487_vm0 = vcmask 293888  }
 0x242   : > { %v3483_v63 = vsel %vm3482_vm14, %v3478_v26, %v3167_v62  ;;  %v3426_v31 = vsel %vm3422_vm4, %v3421_v12, %v5324_v58  ;;  %v3414_v25 = vsel %vm3412_vm2, %v3409_v13, %v5173_v44  ;;  %v2627_v53 = vcombine.high %v2570_v5, %v2602_v57 }
 0x243   : > { %3394 = vrot.lane.b32.xlu0 %v2769_v45, %s3862_s5  ;;  %v3431_v2 = vsel %vm3427_vm5, %v3426_v31, %v5342_v60  ;;  %3268 = vrot.lane.b32.xlu1 %v2361_v18, %s3854_s25  ;;  %v3419_v41 = vsel %vm3417_vm3, %v3414_v25, %v5244_v48  ;;  %v2874_v60 = vrot.slane %v2866_v8, %v4081_v40  ;;  %vm3492_vm1 = vcmask 310272   ;;  %s3864_s25 = smov [#allocation2]  }
 0x244   : > { %v3436_v27 = vsel %vm3432_vm6, %v3431_v2, %v3013_v37  ;;  %v3424_v58 = vsel %vm3422_vm4, %v3419_v41, %v5313_v14  ;;  %vm3497_vm2 = vcmask 326656   ;;  %v2803_v2 = vcombine.high %v5981_v11, %v5980_v39  ;;  %v5990_v41 = vld [vmem:[#allocation85_spill] sm:$0xff] }
 0x245   : > { %v3171_v20 = vpop.permute.xlu0 %3170  ;;  %v3441_v26 = vsel %vm3437_vm7, %v3436_v27, %v3029_v34  ;;  %v3045_v44 = vpop.permute.xlu1 %3044  ;;  %v3429_v33 = vsel %vm3427_vm5, %v3424_v58, %v5331_v32  ;;  %v2898_v4 = vcombine.low %v2842_v21, %v2874_v60  ;;  %v2563_v32 = vcombine.high %v5379_v47, %v5383_v38 }
 0x246   : > { %v3485_v15 = vsel %vm3482_vm14, %v3480_v50, %v3171_v20  ;;  %v3446_v48 = vsel %vm3442_vm8, %v3441_v26, %v3045_v44  ;;  %v3434_v37 = vsel %vm3432_vm6, %v3429_v33, %v5357_v56  ;;  %v2595_v56 = vcombine.high %v5386_v24, %v5389_v36 }
 0x247   : > { %3280 = vrot.lane.b32.xlu1 %v2626_v43, %s3855_s27  ;;  %v3439_v14 = vsel %vm3437_vm7, %v3434_v37, %v3025_v23  ;;  %v2577_v8 = vrot.slane %v2563_v32, %v4081_v40  ;;  %v2835_v47 = vcombine.high %v5409_v61, %v5412_v9  ;;  %v2867_v38 = vcombine.high %v5415_v3, %v5418_v52 }
 0x248   : > { %v3444_v34 = vsel %vm3442_vm8, %v3439_v14, %v3041_v30  ;;  %v2609_v12 = vrot.slane %v2595_v56, %v4081_v40  ;;  %v2899_v5 = vcombine.high %v2842_v21, %v2874_v60  ;;  %v2499_v30 = vcombine.high %v5969_v28, %v5968_v51 }
 0x249   : > { %v3183_v17 = vpop.permute.xlu0 %3182  ;;  %v3057_v46 = vpop.permute.xlu1 %3056  ;;  %v2531_v61 = vcombine.high %v5973_v1, %v5972_v6  ;;  %v2547_v9 = vcombine.high %v5975_v59, %v5974_v42  ;;  %v2849_v31 = vrot.slane %v2835_v47, %v4081_v40  ;;  %v2881_v51 = vrot.slane %v2867_v38, %v4081_v40 }
 0x24a   : > { %v3488_v50 = vsel %vm3487_vm0, %v3483_v63, %v3183_v17  ;;  %v3449_v19 = vsel %vm3447_vm9, %v3444_v34, %v3057_v46  ;;  %v2515_v63 = vcombine.high %v5971_v54, %v5970_v55  ;;  %v2628_v13 = vcombine.low %v2577_v8, %v2609_v12 }
 0x24b   : > { %3284 = vrot.lane.b32.xlu1 %v2898_v4, %s3855_s27  ;;  %v2513_v55 = vrot.slane %v2499_v30, %v4054_v16  ;;  %v2545_v6 = vrot.slane %v2531_v61, %v4054_v16  ;;  %v2561_v1 = vrot.slane %v2547_v9, %v4054_v16  ;;  %v2771_v42 = vcombine.high %v5977_v10, %v5976_v49  ;;  %s3770_s27 = sshll.u32 %s3864_s25, 4  ;;  %s3771_s27 = int_to_ptr.vmem [resolvable:$false] %s3770_s27 }
 0x24c   : > { %v2529_v54 = vrot.slane %v2515_v63, %v4054_v16  ;;  %v2787_v59 = vcombine.high %v5979_v0, %v5978_v29  ;;  %v2819_v27 = vcombine.high %v5990_v41, %v5982_v7  ;;  %v2900_v21 = vcombine.low %v2849_v31, %v2881_v51 }
 0x24d   : > { %v3187_v35 = vpop.permute.xlu0 %3186  ;;  %v3061_v22 = vpop.permute.xlu1 %3060  ;;  %v2610_v49 = vcombine.low %v2545_v6, %v2561_v1  ;;  %v2785_v10 = vrot.slane %v2771_v42, %v4054_v16  ;;  %v2629_v0 = vcombine.high %v2577_v8, %v2609_v12  ;;  %v2817_v39 = vrot.slane %v2803_v2, %v4054_v16 }
 0x24e   : > { %v3490_v23 = vsel %vm3487_vm0, %v3485_v15, %v3187_v35  ;;  %v3451_v62 = vsel %vm3447_vm9, %v3446_v48, %v3061_v22  ;;  %v2578_v26 = vcombine.low %v2513_v55, %v2529_v54  ;;  %v2801_v44 = vrot.slane %v2787_v59, %v4054_v16 }
 0x24f   : > { %3296 = vrot.lane.b32.xlu1 %v2627_v53, %s3856_s28  ;;  %v2833_v11 = vrot.slane %v2819_v27, %v4054_v16  ;;  %vm3502_vm3 = vcmask 343040   ;;  %v2618_v37 = vrot.slane %v2610_v49, %v4081_v40  ;;  %v2901_v16 = vcombine.high %v2849_v31, %v2881_v51 }
 0x250   : > { %v2586_v48 = vrot.slane %v2578_v26, %v4081_v40  ;;  %v2850_v14 = vcombine.low %v2785_v10, %v2801_v44  ;;  %v2579_v12 = vcombine.high %v2513_v55, %v2529_v54  ;;  %v2611_v38 = vcombine.high %v2545_v6, %v2561_v1 }
 0x251   : > { %v3199_v45 = vpop.permute.xlu0 %3198  ;;  %v3073_v24 = vpop.permute.xlu1 %3072  ;;  %v2882_v17 = vcombine.low %v2817_v39, %v2833_v11  ;;  %v2851_v63 = vcombine.high %v2785_v10, %v2801_v44  ;;  %v2883_v61 = vcombine.high %v2817_v39, %v2833_v11  ;;  %vm5991_vm4 = vcmask 244736  }
 0x252   : > { %v3493_v36 = vsel %vm3492_vm1, %v3488_v50, %v3199_v45  ;;  %v3454_v57 = vsel %vm3452_vm10, %v3449_v19, %v3073_v24  ;;  %v2630_v56 = vcombine.low %v2586_v48, %v2618_v37  ;;  %v2858_v35 = vrot.slane %v2850_v14, %v4081_v40  ;;  %vm5992_vm5 = vmmov %vm5991_vm4 }
 0x253   : > { %3300 = vrot.lane.b32.xlu1 %v2899_v5, %s3856_s28  ;;  %v2890_v22 = vrot.slane %v2882_v17, %v4081_v40  ;;  %v2593_v30 = vrot.slane %v2579_v12, %v4081_v40  ;;  %v2897_v55 = vrot.slane %v2883_v61, %v4081_v40  ;;  %vm3507_vm6 = vcmask 359424   ;;  %s3772_s28 = scalar_lea.vmem %s3771_s27, 1024 }
 0x254   : > { %vm3512_vm7 = vcmask 375808   ;;  %vm3517_vm8 = vcmask 392192   ;;  %vm3522_vm9 = vcmask 408576  }
 0x255   : > { %v3203_v3 = vpop.permute.xlu0 %3202  ;;  %v3077_v52 = vpop.permute.xlu1 %3076  ;;  %v2902_v45 = vcombine.low %v2858_v35, %v2890_v22 }
 0x256   : > { %v3495_v18 = vsel %vm3492_vm1, %v3490_v23, %v3203_v3  ;;  %v3456_v28 = vsel %vm3452_vm10, %v3451_v62, %v3077_v52  ;;  %v2903_v3 = vcombine.high %v2858_v35, %v2890_v22  ;;  %v2625_v52 = vrot.slane %v2611_v38, %v4081_v40 }
 0x257   : > { %3312 = vrot.lane.b32.xlu1 %v2628_v13, %s3857_s29  ;;  %vm3527_vm10 = vcmask 424960  }
 0x258   : > { %v2632_v51 = vcombine.low %v2593_v30, %v2625_v52  ;;  %v2633_v41 = vcombine.high %v2593_v30, %v2625_v52 }
 0x259   : > { %v3215_v25 = vpop.permute.xlu0 %3214  ;;  %v3089_v20 = vpop.permute.xlu1 %3088 }
 0x25a   : > { %v3498_v43 = vsel %vm3497_vm2, %v3493_v36, %v3215_v25  ;;  %v3459_v58 = vsel %vm3457_vm11, %v3454_v57, %v3089_v20  ;;  %v2631_v36 = vcombine.high %v2586_v48, %v2618_v37 }
 0x25b   : > { %3316 = vrot.lane.b32.xlu1 %v2900_v21, %s3857_s29 }
 0x25d   : > { %v3219_v29 = vpop.permute.xlu0 %3218  ;;  %v3093_v7 = vpop.permute.xlu1 %3092 }
 0x25e   : > { %v3500_v15 = vsel %vm3497_vm2, %v3495_v18, %v3219_v29  ;;  %v3461_v60 = vsel %vm3457_vm11, %v3456_v28, %v3093_v7  ;;  %v2865_v28 = vrot.slane %v2851_v63, %v4081_v40  ;;  %vm3532_vm11 = vcmask 441344  }
 0x25f   : > { %3328 = vrot.lane.b32.xlu1 %v2629_v0, %s3858_s30 }
 0x260   : > { %v2904_v42 = vcombine.low %v2865_v28, %v2897_v55 }
 0x261   : > { %v3231_v33 = vpop.permute.xlu0 %3230  ;;  %v3105_v34 = vpop.permute.xlu1 %3104 }
 0x262   : > { %v5530_v46 = vsel %vm3502_vm3, %v3498_v43, %v3231_v33  ;;  %v3464_v50 = vsel %vm3462_vm12, %v3459_v58, %v3105_v34  ;;  %v2905_v43 = vcombine.high %v2865_v28, %v2897_v55 }
 0x263   : > { %3332 = vrot.lane.b32.xlu1 %v2901_v16, %s3858_s30 }
 0x265   : > { %v3235_v4 = vpop.permute.xlu0 %3234  ;;  %v3109_v19 = vpop.permute.xlu1 %3108 }
 0x266   : > { %v5535_v32 = vsel %vm3502_vm3, %v3500_v15, %v3235_v4  ;;  %v3466_v23 = vsel %vm3462_vm12, %v3461_v60, %v3109_v19  ;;  %vm3537_vm12 = vcmask 457728  }
 0x267   : > { %3344 = vrot.lane.b32.xlu1 %v2630_v56, %s3859_s2 }
 0x269   : > { %v5541_v53 = vpop.permute.xlu0 %3246  ;;  %v3121_v62 = vpop.permute.xlu1 %3120 }
 0x26a   : > { %v3469_v8 = vsel %vm3467_vm13, %v3464_v50, %v3121_v62 }
 0x26b   : > { %3348 = vrot.lane.b32.xlu1 %v2902_v45, %s3859_s2  ;;  %v3508_v45 = vsel %vm3507_vm6, %v5530_v46, %v5541_v53 }
 0x26d   : > { %v5545_v47 = vpop.permute.xlu0 %3250  ;;  %v3125_v24 = vpop.permute.xlu1 %3124 }
 0x26e   : > { %v3471_v5 = vsel %vm3467_vm13, %v3466_v23, %v3125_v24  ;;  %vm3542_vm13 = vcmask 474112  }
 0x26f   : > { %3360 = vrot.lane.b32.xlu1 %v2631_v36, %s3860_s3 }
 0x271   : > { %v5549_v57 = vpop.permute.xlu0 %3262  ;;  %v3137_v9 = vpop.permute.xlu1 %3136 }
 0x272   : > { %v3474_v18 = vsel %vm5991_vm4, %v3469_v8, %v3137_v9  ;;  %v3513_v12 = vsel %vm3512_vm7, %v3508_v45, %v5549_v57 }
 0x273   : > { %3364 = vrot.lane.b32.xlu1 %v2903_v3, %s3860_s3 }
 0x275   : > { %v5555_v13 = vpop.permute.xlu0 %3266  ;;  %v3141_v31 = vpop.permute.xlu1 %3140 }
 0x276   : > { %v3476_v54 = vsel %vm5992_vm5, %v3471_v5, %v3141_v31  ;;  %v3510_v5 = vsel %vm3507_vm6, %v5535_v32, %v5545_v47 }
 0x277   : > { %3376 = vrot.lane.b32.xlu1 %v2632_v51, %s3861_s4  ;;  %v3515_v53 = vsel %vm3512_vm7, %v3510_v5, %v5555_v13 }
 0x279   : > { %v3279_v6 = vpop.permute.xlu0 %3278  ;;  %v3153_v1 = vpop.permute.xlu1 %3152 }
 0x27a   : > { %v3479_v59 = vsel %vm3477_vm15, %v3474_v18, %v3153_v1  ;;  %v3518_v24 = vsel %vm3517_vm8, %v3513_v12, %v3279_v6 }
 0x27b   : > { %3380 = vrot.lane.b32.xlu1 %v2904_v42, %s3861_s4 }
 0x27d   : > { %v3283_v25 = vpop.permute.xlu0 %3282  ;;  %v3157_v2 = vpop.permute.xlu1 %3156 }
 0x27e   : > { %v3481_v27 = vsel %vm3477_vm15, %v3476_v54, %v3157_v2  ;;  %v3520_v61 = vsel %vm3517_vm8, %v3515_v53, %v3283_v25 }
 0x27f   : > { %3392 = vrot.lane.b32.xlu1 %v2633_v41, %s3862_s5 }
 0x281   : > { %v3295_v20 = vpop.permute.xlu0 %3294  ;;  %v3169_v40 = vpop.permute.xlu1 %3168 }
 0x282   : > { %v3484_v21 = vsel %vm3482_vm14, %v3479_v59, %v3169_v40  ;;  %v3523_v36 = vsel %vm3522_vm9, %v3518_v24, %v3295_v20 }
 0x283   : > { %3396 = vrot.lane.b32.xlu1 %v2905_v43, %s3862_s5 }
 0x285   : > { %v3299_v58 = vpop.permute.xlu0 %3298  ;;  %v3173_v26 = vpop.permute.xlu1 %3172 }
 0x286   : > { %v3486_v49 = vsel %vm3482_vm14, %v3481_v27, %v3173_v26  ;;  %vm3547_vm14 = vcmask 490496   ;;  %v3525_v3 = vsel %vm3522_vm9, %v3520_v61, %v3299_v58 }
 0x289   : > { %v3311_v10 = vpop.permute.xlu0 %3310  ;;  %v3185_v29 = vpop.permute.xlu1 %3184 }
 0x28a   : > { %v3489_v0 = vsel %vm3487_vm0, %v3484_v21, %v3185_v29  ;;  %v3528_v30 = vsel %vm3527_vm10, %v3523_v36, %v3311_v10 }
 0x28d   : > { %v3315_v44 = vpop.permute.xlu0 %3314  ;;  %v3189_v39 = vpop.permute.xlu1 %3188 }
 0x28e   : > { %v3491_v11 = vsel %vm3487_vm0, %v3486_v49, %v3189_v39  ;;  %vm3552_vm0 = vcmask 506880   ;;  %v3530_v47 = vsel %vm3527_vm10, %v3525_v3, %v3315_v44 }
 0x291   : > { %v3327_v7 = vpop.permute.xlu0 %3326  ;;  %v3201_v15 = vpop.permute.xlu1 %3200 }
 0x292   : > { %v3494_v60 = vsel %vm3492_vm1, %v3489_v0, %v3201_v15  ;;  %v3533_v57 = vsel %vm3532_vm11, %v3528_v30, %v3327_v7 }
 0x295   : > { %v3331_v33 = vpop.permute.xlu0 %3330  ;;  %v3205_v48 = vpop.permute.xlu1 %3204 }
 0x296   : > { %v3496_v37 = vsel %vm3492_vm1, %v3491_v11, %v3205_v48  ;;  %v3535_v13 = vsel %vm3532_vm11, %v3530_v47, %v3331_v33  ;;  %vm3589_vm1 = vcmask 523264  }
 0x299   : > { %v3343_v14 = vpop.permute.xlu0 %3342  ;;  %v3217_v17 = vpop.permute.xlu1 %3216 }
 0x29a   : > { %v3499_v34 = vsel %vm3497_vm2, %v3494_v60, %v3217_v17  ;;  %v3538_v9 = vsel %vm3537_vm12, %v3533_v57, %v3343_v14 }
 0x29d   : > { %v3347_v16 = vpop.permute.xlu0 %3346  ;;  %v3221_v50 = vpop.permute.xlu1 %3220 }
 0x29e   : > { %v3501_v4 = vsel %vm3497_vm2, %v3496_v37, %v3221_v50  ;;  %v3540_v28 = vsel %vm3537_vm12, %v3535_v13, %v3347_v16  ;;  %vm3594_vm2 = vcmask 785408  }
 0x2a1   : > { %v3359_v19 = vpop.permute.xlu0 %3358  ;;  %v3233_v56 = vpop.permute.xlu1 %3232 }
 0x2a2   : > { %v3504_v35 = vsel %vm3502_vm3, %v3499_v34, %v3233_v56  ;;  %v3543_v32 = vsel %vm3542_vm13, %v3538_v9, %v3359_v19 }
 0x2a5   : > { %v3363_v22 = vpop.permute.xlu0 %3362  ;;  %v3237_v23 = vpop.permute.xlu1 %3236 }
 0x2a6   : > { %v3506_v62 = vsel %vm3502_vm3, %v3501_v4, %v3237_v23  ;;  %v3545_v55 = vsel %vm3542_vm13, %v3540_v28, %v3363_v22 }
 0x2a9   : > { %v3375_v8 = vpop.permute.xlu0 %3374  ;;  %v3249_v38 = vpop.permute.xlu1 %3248 }
 0x2aa   : > { %v3548_v52 = vsel %vm3547_vm14, %v3543_v32, %v3375_v8  ;;  %v3509_v10 = vsel %vm3507_vm6, %v3504_v35, %v3249_v38 }
 0x2ad   : > { %v3379_v46 = vpop.permute.xlu0 %3378  ;;  %v3253_v63 = vpop.permute.xlu1 %3252 }
 0x2ae   : > { %v3550_v54 = vsel %vm3547_vm14, %v3545_v55, %v3379_v46  ;;  %v3511_v11 = vsel %vm3507_vm6, %v3506_v62, %v3253_v63 }
 0x2b1   : > { %v3391_v18 = vpop.permute.xlu0 %3390  ;;  %v3265_v31 = vpop.permute.xlu1 %3264 }
 0x2b2   : > { %v3553_v51 = vsel %vm3552_vm0, %v3548_v52, %v3391_v18  ;;  %v3514_v0 = vsel %vm3512_vm7, %v3509_v10, %v3265_v31 }
 0x2b3   : > { %3561 = vrot.lane.b32.xlu0 %v3553_v51, %s3847_s18 }
 0x2b5   : > { %v3395_v6 = vpop.permute.xlu0 %3394  ;;  %v3269_v1 = vpop.permute.xlu1 %3268 }
 0x2b6   : > { %v3555_v42 = vsel %vm3552_vm0, %v3550_v54, %v3395_v6  ;;  %v3516_v60 = vsel %vm3512_vm7, %v3511_v11, %v3269_v1 }
 0x2b7   : > { %3565 = vrot.lane.b32.xlu0 %v3555_v42, %s3847_s18 }
 0x2b9   : > { %v3281_v59 = vpop.permute.xlu1 %3280 }
 0x2ba   : > { %v3519_v44 = vsel %vm3517_vm8, %v3514_v0, %v3281_v59 }
 0x2bb   : > { %3573 = vrot.lane.b32.xlu0 %v3553_v51, %s3863_s11 }
 0x2bd   : > { %v3285_v25 = vpop.permute.xlu1 %3284 }
 0x2be   : > { %v3521_v48 = vsel %vm3517_vm8, %v3516_v60, %v3285_v25 }
 0x2bf   : > { %3577 = vrot.lane.b32.xlu0 %v3555_v42, %s3863_s11 }
 0x2c1   : > { %v3297_v2 = vpop.permute.xlu1 %3296 }
 0x2c2   : > { %v3524_v39 = vsel %vm3522_vm9, %v3519_v44, %v3297_v2 }
 0x2c5   : > { %v3301_v41 = vpop.permute.xlu1 %3300 }
 0x2c6   : > { %v3526_v14 = vsel %vm3522_vm9, %v3521_v48, %v3301_v41 }
 0x2c9   : > { %v3313_v27 = vpop.permute.xlu1 %3312 }
 0x2ca   : > { %v3529_v7 = vsel %vm3527_vm10, %v3524_v39, %v3313_v27 }
 0x2cd   : > { %v3317_v20 = vpop.permute.xlu1 %3316 }
 0x2ce   : > { %v3531_v34 = vsel %vm3527_vm10, %v3526_v14, %v3317_v20 }
 0x2d1   : > { %v3329_v40 = vpop.permute.xlu1 %3328 }
 0x2d2   : > { %v3534_v33 = vsel %vm3532_vm11, %v3529_v7, %v3329_v40 }
 0x2d5   : > { %v3333_v43 = vpop.permute.xlu1 %3332 }
 0x2d6   : > { %v3536_v4 = vsel %vm3532_vm11, %v3531_v34, %v3333_v43 }
 0x2d9   : > { %v3345_v21 = vpop.permute.xlu1 %3344 }
 0x2da   : > { %v3539_v37 = vsel %vm3537_vm12, %v3534_v33, %v3345_v21 }
 0x2dd   : > { %v3349_v58 = vpop.permute.xlu1 %3348 }
 0x2de   : > { %v3541_v56 = vsel %vm3537_vm12, %v3536_v4, %v3349_v58 }
 0x2e1   : > { %v3361_v26 = vpop.permute.xlu1 %3360 }
 0x2e2   : > { %v3544_v17 = vsel %vm3542_vm13, %v3539_v37, %v3361_v26 }
 0x2e5   : > { %v3365_v49 = vpop.permute.xlu1 %3364 }
 0x2e6   : > { %v3546_v35 = vsel %vm3542_vm13, %v3541_v56, %v3365_v49 }
 0x2e9   : > { %v3377_v29 = vpop.permute.xlu1 %3376 }
 0x2ea   : > { %v3549_v16 = vsel %vm3547_vm14, %v3544_v17, %v3377_v29 }
 0x2ed   : > { %v3381_v15 = vpop.permute.xlu1 %3380 }
 0x2ee   : > { %v3551_v22 = vsel %vm3547_vm14, %v3546_v35, %v3381_v15 }
 0x2f1   : > { %v3393_v50 = vpop.permute.xlu1 %3392 }
 0x2f2   : > { %v3554_v19 = vsel %vm3552_vm0, %v3549_v16, %v3393_v50 }
 0x2f3   : > { %3563 = vrot.lane.b32.xlu1 %v3554_v19, %s3847_s18 }
 0x2f5   : > { %v3397_v23 = vpop.permute.xlu1 %3396 }
 0x2f6   : > { %v3556_v62 = vsel %vm3552_vm0, %v3551_v22, %v3397_v23 }
 0x2f7   : > { %3567 = vrot.lane.b32.xlu1 %v3556_v62, %s3847_s18  ;;  %s110_s18 = scalar_lea.vmem [#allocation2], %s3683_s14 }
 0x2f8   : > { %s3617_s19 = sshll.u32 %s110_s18, 4  ;;  %s5644_s19 = int_to_ptr.vmem [resolvable:$true] %s3617_s19 }
 0x2f9   : > { %s3766_s10 = scalar_lea.vmem %s5644_s19, 512  ;;  %p3773_p0 = scmp.lt.s32.totalorder %s5644_s19, %s3771_s27 }
 0x2fa   : > { %p3767_p11 = scmp.ne.s32.totalorder %s5644_s19, %s3766_s10  ;;  %p3774_p1 = scmp.lt.s32.totalorder %s3772_s28, %s3766_s10 }
 0x2fb   : > { %3575 = vrot.lane.b32.xlu1 %v3554_v19, %s3863_s11 }
 0x2fc   : > { %p3768_p12 = pnand %p3767_p11, %p3914_p5  ;;  %p3775_p2 = por %p3774_p1, %p3773_p0 }
 0x2fe   : > { %p3769_p13 = pneg %p3768_p12 }
 0x2ff   : > { %3579 = vrot.lane.b32.xlu1 %v3556_v62, %s3863_s11 }
 0x300   : > { %p3776_p3 = pnand %p3775_p2, %p3769_p13 }
 0x325   : > { %v3562_v45 = vpop.permute.xlu0 %3561 }
 0x326   : > { %v3585_v12 = vsel %vm3477_vm15, %v3553_v51, %v3562_v45 }
 0x327   : > { %v3590_v38 = vsel %vm3589_vm1, %v3585_v12, %v3562_v45 }
 0x329   : > { %v3566_v8 = vpop.permute.xlu0 %3565 }
 0x32a   : > { %v3587_v36 = vsel %vm3477_vm15, %v3555_v42, %v3566_v8 }
 0x32b   : > { %v3592_v30 = vsel %vm3589_vm1, %v3587_v36, %v3566_v8 }
 0x32d   : > { %v3574_v24 = vpop.permute.xlu0 %3573 }
 0x32e   : > { %v3595_v5 = vsel %vm3594_vm2, %v3590_v38, %v3574_v24 }
 0x32f   : > { %3599 = vst [vmem:[%s110_s18] sm:$0xff] %v3595_v5 }
 0x331   : > { %v3578_v46 = vpop.permute.xlu0 %3577 }
 0x332   : > { %v3597_v53 = vsel %vm3594_vm2, %v3592_v30, %v3578_v46 }
 0x333   : > { %3601 = vst [vmem:[%s110_s18 + $0x10] sm:$0xff] %v3597_v53 }
 0x365   : > { %v3564_v57 = vpop.permute.xlu1 %3563 }
 0x366   : > { %v3586_v61 = vsel %vm3477_vm15, %v3554_v19, %v3564_v57 }
 0x367   : > { %v3591_v9 = vsel %vm3589_vm1, %v3586_v61, %v3564_v57 }
 0x369   : > { %v3568_v63 = vpop.permute.xlu1 %3567 }
 0x36a   : > { %v3588_v32 = vsel %vm3477_vm15, %v3556_v62, %v3568_v63 }
 0x36b   : > { %v3593_v52 = vsel %vm3589_vm1, %v3588_v32, %v3568_v63 }
 0x36d   : > { %v3576_v3 = vpop.permute.xlu1 %3575 }
 0x36e   : > { %v3596_v47 = vsel %vm3594_vm2, %v3591_v9, %v3576_v3 }
 0x36f   : > { %3600 = vst [vmem:[%s110_s18 + $0x8] sm:$0xff] %v3596_v47 }
 0x371   : > { %v3580_v18 = vpop.permute.xlu1 %3579 }
 0x372   : > { %v3598_v13 = vsel %vm3594_vm2, %v3593_v52, %v3580_v18 }
 0x373   : > { %3602 = vst [vmem:[%s110_s18 + $0x18] sm:$0xff] %v3598_v13 }
 0x374   : > { %3779 = shalt.err (!%p3776_p3)
}
 0x375   : > { %s3780_s29 = scalar_lea.hbm %s5650_s23, 512  ;;  %s3784_s3 = scalar_lea.hbm %s5698_s1, 1024 }
 0x376   : > { %p3781_p4 = scmp.ne.s32.totalorder %s5650_s23, %s3780_s29  ;;  %p3785_p9 = scmp.lt.u32.totalorder %s5650_s23, %s5698_s1 }
 0x377   : > { %p3786_p10 = scmp.lt.u32.totalorder %s3784_s3, %s3780_s29  ;;  %p3788_p12 = scmp.lt.u32.totalorder %s3780_s29, %s5650_s23 }
 0x378   : > { %p3782_p7 = pnand %p3781_p4, %p3914_p5 }
 0x379   : > { %p3787_p11 = por %p3786_p10, %p3785_p9 }
 0x37a   : > { %p3783_p8 = pneg %p3782_p7 }
 0x37b   : > { %p3789_p13 = por %p3788_p12, %p3787_p11 }
 0x37d   : > { %p3790_p0 = pnand %p3789_p13, %p3783_p8 }
 0x37f   : > { %3793 = shalt.err (!%p3790_p0)
}
 0x380   : > { %s3865_s11 = smov 128  }
 0x381   : > { %3692 = dma.vmem_to_hbm [thread:$0]  (%p3914_p5), %s5644_s19, 512, %s5650_s23, %s5655_s24, %s3865_s11, %s3865_s11, %s3835_s26  }
 0x382 PF: > { %p3698_p1 = scmp.ge.s32.totalorder %s3828_s9, 2  ;;  %s3632_s13 = sand.u32 1, %s3816_s6  }
 0x383   : > { %s3633_s14 = scalar_lea.sflag [#allocation3], %s3632_s13 }
 0x384   : > { %p3695_p2 = pnand %p3698_p1, %p3918_p6 }
 0x386   : > { %3811 = dma.done.wait (!%p3695_p2), %s3633_s14, 512  }
 0x387   : > { %3813 = vsyncadd (!%p3695_p2), %s3633_s14, 4294966784  ;;  %p11_p3 = scmp.ge.s32.totalorder %s3901_s12, 4   ;;  %s5993_s6 = smov %s3820_s7 }
 0x388   : > { %s5994_s7 = smov %s3824_s8  ;;  %s5995_s8 = smov %s3912_s15 }
 0x389   : > { %s5996_s9 = smov %s3901_s12  ;;  %13 = sbr.rel (!%p11_p3) target bundleno = 3 (0x3), region = 59 }
 0x390   :  { %3638 = vsyncpa [#allocation3], 1 }
 0x391   :  { %3640 = vsyncpa [#allocation3 + $0x1], 1 }

</bundles_post_ra>
